<compile_context>
chip_gen: v6e
topology: v6e:2x2x1
jax: 0.10.0
libtpu: 0.0.40
codegen_flags: <defaults>
</compile_context>

<pallas_src>
import math

import numpy as np

import jax
import jax.numpy as jnp
from jax.experimental import pallas as pl
from jax.experimental.pallas import tpu as pltpu

# ----------------------------- configuration ------------------------------
SUBGROUP_SIZES = (16, 16, 16, 16)                    # args.subgroup_sizes_ls
MAT_DIMS = tuple(int(math.sqrt(s)) for s in SUBGROUP_SIZES)
GROUP_FEAT_DIM = sum(SUBGROUP_SIZES)                 # G = 64
MAX_MAT_DIM = max(MAT_DIMS)                          # 4
WIDE = MAX_MAT_DIM * GROUP_FEAT_DIM                  # 256 lane-dense working width
NUM_ACTIONS = 8                                      # args.num_actions
LIE_ALG_INIT_SCALE = 1e-3                            # args.lie_alg_init_scale
EXPM_TAYLOR_TERMS = 6                                # powers precomputed => cheap FMAs

B, C, H, W = 2, 4, 16, 16                            # small example shapes
FLAT = C * H * W                                     # 1024 (lane-dense)


# ------------------------------ Pallas kernel ------------------------------
def _fused_lie_action_kernel(act_ref, x_ref, w_enc_ref, b_enc_ref,
                             act_exp_ref, ap_ref, q_ref,
                             w_dec_ref, b_dec_ref, o_ref):
    """Fused forward: encoder linear -> block-diag lie action -> decoder linear.

    act_ref:     [TB, 1]              int32 action index
    x_ref:       [TB, FLAT]           bf16 flattened image tile
    w_enc_ref:   [FLAT, G]            bf16 encoder weight (encode_gfeat stand-in)
    b_enc_ref:   [1, G]               f32 encoder bias
    act_exp_ref: [NUM_ACTIONS, WIDE]  f32 act_params broadcast to per-lane layout
    ap_ref:      [P+1, WIDE]          f32 column-permuted scaled powers of the
                                      antisymmetrized generators
    q_ref:       [G, WIDE]            f32 0/1 lane-selection matrix for feats
    w_dec_ref:   [G, FLAT]            bf16 decoder weight (decode_gfeat stand-in)
    b_dec_ref:   [1, FLAT]            f32 decoder bias
    o_ref:       [TB, FLAT]           f32 output tile
    """
    tb = x_ref.shape[0]

    # ---- encoder linear: bf16 operands, f32 MXU accumulation ----------------
    feats = (jnp.dot(x_ref[...], w_enc_ref[...],
                     preferred_element_type=jnp.float32)
             + b_enc_ref[...])                                  # [TB, G] f32

    # ---- per-lane action coefficient (torch.index_select done in-kernel) ----
    # c[b, G*k + goff_s + 4*i + j] = act_params[act[b], s]
    acts = act_ref[...]                                         # [TB, 1] int32
    iota = jax.lax.broadcasted_iota(jnp.int32, (tb, NUM_ACTIONS), 1)
    onehot = (iota == acts).astype(jnp.float32)                 # [TB, NUM_ACTIONS]
    c = jnp.dot(onehot, act_exp_ref[...],
                preferred_element_type=jnp.float32,
                precision=jax.lax.Precision.HIGHEST)            # [TB, WIDE]

    # ---- expm(c_s * (basis_s - basis_s^T)) via precomputed scaled powers ----
    # e[b, G*k + goff_s + 4*i + j] = expm(...)[i, k] = sum_p c^p * ap[p, col]
    # (pure full-width VPU FMAs; zero matmuls for the exponential)
    ap = ap_ref[...]                                            # [P+1, WIDE]
    e = ap[0:1, :] + c * ap[1:2, :]
    cp = c
    for p in range(2, EXPM_TAYLOR_TERMS + 1):
        cp = cp * c
        e = e + cp * ap[p:p + 1, :]

    # ---- block-diagonal act_repr @ group_feats_mat, fully vectorized --------
    # bq[b, G*k + goff_s + 4*i + j] = feats[b, goff_s + 4*k + j]
    # (exact: q is 0/1 with one nonzero per column, f32 @ HIGHEST precision)
    bq = jnp.dot(feats, q_ref[...],
                 preferred_element_type=jnp.float32,
                 precision=jax.lax.Precision.HIGHEST)           # [TB, WIDE]
    prod = e * bq
    post = prod[:, 0:GROUP_FEAT_DIM]
    for k in range(1, MAX_MAT_DIM):
        post = post + prod[:, k * GROUP_FEAT_DIM:(k + 1) * GROUP_FEAT_DIM]
    # post[b, goff_s + 4*i + j] = sum_k expm_s[b,i,k] * feats[b, goff_s + 4*k + j]

    # ---- decoder linear: bf16 operands, f32 MXU accumulation ----------------
    o_ref[...] = (jnp.dot(post.astype(jnp.bfloat16), w_dec_ref[...],
                          preferred_element_type=jnp.float32)
                  + b_dec_ref[...])


# ------------------------- precomputed kernel tables ------------------------
def _build_expm_and_select_tables(lie_alg_basis_ls, n_terms):
    """ap[P+1, WIDE] (column-permuted scaled powers) and q[G, WIDE] (0/1 select).

    Column  col = G*k + goff_s + mdim_s*i + j  (k < mdim_s; zero otherwise):
        ap[p, col] = ((basis_s - basis_s^T)^p / p!)[i, k]
        q[goff_s + mdim_s*k + j, col] = 1
    so post = chunk-sum_k (sum_p c^p ap[p]) * (feats @ q) reproduces
    to_group_feats(act_repr @ to_group_matrix(feats)).
    """
    ap = np.zeros((n_terms + 1, WIDE), np.float64)
    q = np.zeros((GROUP_FEAT_DIM, WIDE), np.float32)
    goff = 0
    for s, mdim in enumerate(MAT_DIMS):
        basis = np.asarray(lie_alg_basis_ls[s][0], np.float64)
        anti = basis - basis.T
        cur = np.eye(mdim)
        pows = [cur.copy()]
        for p in range(1, n_terms + 1):
            cur = cur @ anti
            pows.append(cur / math.factorial(p))
        for k in range(min(mdim, MAX_MAT_DIM)):
            for i in range(mdim):
                for j in range(mdim):
                    col = GROUP_FEAT_DIM * k + goff + mdim * i + j
                    for p in range(n_terms + 1):
                        ap[p, col] = pows[p][i, k]
                    q[goff + mdim * k + j, col] = 1.0
        goff += mdim * mdim
    return jnp.asarray(ap, jnp.float32), jnp.asarray(q, jnp.float32)


def _expand_act_params(act_params):
    """[NUM_ACTIONS, n_sub] -> [NUM_ACTIONS, WIDE] per-lane coefficient table."""
    rep = jnp.repeat(act_params, repeats=np.asarray(SUBGROUP_SIZES), axis=1,
                     total_repeat_length=GROUP_FEAT_DIM)        # [A, G]
    return jnp.tile(rep, (1, MAX_MAT_DIM))                      # [A, WIDE]


# ------------------------------- wrapper -----------------------------------
def _default_tile_b(bsz):
    tile = 256                       # v6e / v7x: 2x256 MXU -> 256-row M tiles
    try:
        kind = jax.devices()[0].device_kind.lower()
        if "v5" in kind:
            tile = 128               # v5e: 4x128 MXU, 16 MiB scoped VMEM default
    except Exception:
        pass
    if bsz < tile:                   # tiny batches: one tile, bf16 sublane packing
        tile = max(16, ((bsz + 15) // 16) * 16)
    return tile


def lie_action_forward(params, x, act, tile_b=None):
    """LieAction.forward((x, act)) as a single fused, batch-tiled pallas_call."""
    bsz = x.shape[0]
    x_flat = x.reshape(bsz, -1).astype(jnp.bfloat16)   # cast once; halves HBM/DMA
    flat = x_flat.shape[1]

    if tile_b is None:
        tile_b = _default_tile_b(bsz)
    bpad = ((bsz + tile_b - 1) // tile_b) * tile_b
    pad = bpad - bsz
    x_p = jnp.pad(x_flat, ((0, pad), (0, 0)))
    act_p = jnp.pad(act.reshape(bsz, 1).astype(jnp.int32), ((0, pad), (0, 0)))
    act_exp = _expand_act_params(params["act_params"])          # [A, WIDE]

    def resident(arr):   # loaded once, stays in VMEM across all grid steps
        return pl.BlockSpec(arr.shape, lambda i: (0, 0))

    out_p = pl.pallas_call(
        _fused_lie_action_kernel,
        out_shape=jax.ShapeDtypeStruct((bpad, flat), jnp.float32),
        grid_spec=pltpu.PrefetchScalarGridSpec(
            num_scalar_prefetch=0,
            grid=(bpad // tile_b,),
            in_specs=[
                pl.BlockSpec((tile_b, 1), lambda i: (i, 0)),     # act
                pl.BlockSpec((tile_b, flat), lambda i: (i, 0)),  # x (bf16)
                resident(params["w_enc"]),
                resident(params["b_enc"]),
                resident(act_exp),
                resident(params["ap256"]),
                resident(params["qmat"]),
                resident(params["w_dec"]),
                resident(params["b_dec"]),
            ],
            out_specs=pl.BlockSpec((tile_b, flat), lambda i: (i, 0)),
        ),
        compiler_params=pltpu.CompilerParams(
            dimension_semantics=("parallel",)),
    )(act_p, x_p, params["w_enc"], params["b_enc"], act_exp,
      params["ap256"], params["qmat"], params["w_dec"], params["b_dec"])

    return out_p[:bsz].reshape(x.shape)


# ------------------------- parameter construction ---------------------------
def init_params(key):
    ks = jax.random.split(key, 10)
    lie_alg_basis_ls = [
        LIE_ALG_INIT_SCALE * jax.random.normal(ks[1 + i], (1, m, m), jnp.float32)
        for i, m in enumerate(MAT_DIMS)
    ]
    ap256, qmat = _build_expm_and_select_tables(lie_alg_basis_ls,
                                                EXPM_TAYLOR_TERMS)
    return {
        # LieAction.act_params ~ N(0, lie_alg_init_scale), [num_actions, n_sub]
        "act_params": LIE_ALG_INIT_SCALE
        * jax.random.normal(ks[0], (NUM_ACTIONS, len(SUBGROUP_SIZES)),
                            jnp.float32),
        # frozen decoder lie_alg_basis_ls (list of [1, m, m])
        "lie_alg_basis_ls": lie_alg_basis_ls,
        # linear stand-ins for LieCeleb encode_gfeat / decode_gfeat; frozen ->
        # stored bf16 so the MXU gets native-rate operands.
        "w_enc": (0.02 * jax.random.normal(
            ks[5], (FLAT, GROUP_FEAT_DIM), jnp.float32)).astype(jnp.bfloat16),
        "b_enc": 0.01 * jax.random.normal(ks[6], (1, GROUP_FEAT_DIM), jnp.float32),
        "w_dec": (0.02 * jax.random.normal(
            ks[7], (GROUP_FEAT_DIM, FLAT), jnp.float32)).astype(jnp.bfloat16),
        "b_dec": 0.01 * jax.random.normal(ks[8], (1, FLAT), jnp.float32),
        # frozen generators -> precomputed tables for the in-kernel expm/apply
        "ap256": ap256,
        "qmat": qmat,
    }


# --------------------------- pure-JAX reference -----------------------------
def reference_forward(params, x, act):
    """Straightforward (dense blocks, 12-term Taylor expm, f32) reference."""
    bsz = x.shape[0]
    x_flat = x.reshape(bsz, -1)
    feats = jnp.dot(x_flat.astype(jnp.bfloat16), params["w_enc"],
                    preferred_element_type=jnp.float32) + params["b_enc"]
    act_coef = params["act_params"][act.reshape(bsz)]            # [B, n_sub]

    out_blocks = []
    goff = 0
    for s, mdim in enumerate(MAT_DIMS):
        basis = params["lie_alg_basis_ls"][s][0]
        anti = basis - basis.T
        alg = act_coef[:, s][:, None, None] * anti[None, :, :]   # [B, m, m]
        eye = jnp.broadcast_to(jnp.eye(mdim, dtype=jnp.float32), (bsz, mdim, mdim))
        term, expm = eye, eye
        for k in range(1, 13):
            term = jnp.einsum("bij,bjk->bik", term, alg) / float(k)
            expm = expm + term
        g_blk = feats[:, goff:goff + mdim * mdim].reshape(bsz, mdim, mdim)
        out_blocks.append(
            jnp.einsum("bij,bjk->bik", expm, g_blk).reshape(bsz, mdim * mdim))
        goff += mdim * mdim
    post = jnp.concatenate(out_blocks, axis=-1)

    out = jnp.dot(post.astype(jnp.bfloat16), params["w_dec"],
                  preferred_element_type=jnp.float32) + params["b_dec"]
    return out.reshape(x.shape)


# --------------------------------- main -------------------------------------
if __name__ == "__main__":
    key = jax.random.PRNGKey(0)
    k_param, k_x, k_act = jax.random.split(key, 3)

    params = init_params(k_param)
    x = jax.random.normal(k_x, (B, C, H, W), jnp.float32)            # NCHW
    act = jax.random.randint(k_act, (B, 1), 0, NUM_ACTIONS, jnp.int32)

    fwd = jax.jit(lie_action_forward)
    out = fwd(params, x, act)
    jax.block_until_ready(out)

    assert out.shape == (B, C, H, W), out.shape
    assert bool(jnp.all(jnp.isfinite(out)))

    ref = jax.jit(reference_forward)(params, x, act)
    jax.block_until_ready(ref)
    max_diff = float(jnp.max(jnp.abs(out - ref)))
    max_ref = float(jnp.max(jnp.abs(ref)))
    assert max_diff <= 1e-3 + 1e-3 * max_ref, (max_diff, max_ref)

    print("KERNEL_OK")
</pallas_src>

<mosaic_0001>
module attributes {stable_mosaic.version = 11 : i64} {
  func.func @_fused_lie_action_kernel(%arg0: i32, %arg1: memref<16x1xi32, #tpu.memory_space<vmem>>, %arg2: memref<16x1024xbf16, #tpu.memory_space<vmem>>, %arg3: memref<1024x64xbf16, #tpu.memory_space<vmem>>, %arg4: memref<1x64xf32, #tpu.memory_space<vmem>>, %arg5: memref<8x256xf32, #tpu.memory_space<vmem>>, %arg6: memref<7x256xf32, #tpu.memory_space<vmem>>, %arg7: memref<64x256xf32, #tpu.memory_space<vmem>>, %arg8: memref<64x1024xbf16, #tpu.memory_space<vmem>>, %arg9: memref<1x1024xf32, #tpu.memory_space<vmem>>, %arg10: memref<16x1024xf32, #tpu.memory_space<vmem>>) attributes {dimension_semantics = [#tpu.dimension_semantics<parallel>], iteration_bounds = array<i64: 1>, scalar_prefetch = 0 : i64, scratch_operands = 0 : i64, tpu.core_type = #tpu.core_type<tc>, window_params = [{transform_indices = @transform_0, window_bounds = array<i64: 16, 1>}, {transform_indices = @transform_1, window_bounds = array<i64: 16, 1024>}, {pipeline_mode = #tpu.pipeline_mode<synchronous>, transform_indices = @transform_2, window_bounds = array<i64: 1024, 64>}, {pipeline_mode = #tpu.pipeline_mode<synchronous>, transform_indices = @transform_3, window_bounds = array<i64: 1, 64>}, {pipeline_mode = #tpu.pipeline_mode<synchronous>, transform_indices = @transform_4, window_bounds = array<i64: 8, 256>}, {pipeline_mode = #tpu.pipeline_mode<synchronous>, transform_indices = @transform_5, window_bounds = array<i64: 7, 256>}, {pipeline_mode = #tpu.pipeline_mode<synchronous>, transform_indices = @transform_6, window_bounds = array<i64: 64, 256>}, {pipeline_mode = #tpu.pipeline_mode<synchronous>, transform_indices = @transform_7, window_bounds = array<i64: 64, 1024>}, {pipeline_mode = #tpu.pipeline_mode<synchronous>, transform_indices = @transform_8, window_bounds = array<i64: 1, 1024>}, {transform_indices = @transform_9, window_bounds = array<i64: 16, 1024>}]} {
    %c0 = arith.constant 0 : index
    %c0_0 = arith.constant 0 : index
    %0 = vector.load %arg2[%c0, %c0_0] : memref<16x1024xbf16, #tpu.memory_space<vmem>>, vector<16x1024xbf16>
    %c0_1 = arith.constant 0 : index
    %c0_2 = arith.constant 0 : index
    %1 = vector.load %arg3[%c0_1, %c0_2] : memref<1024x64xbf16, #tpu.memory_space<vmem>>, vector<1024x64xbf16>
    %cst = arith.constant dense<0.000000e+00> : vector<16x64xf32>
    %2 = tpu.matmul %0, %1, %cst {dimension_numbers = #tpu.dot_dimension_numbers<[1], [0], [0], [1], [0, 0, 1, 1], [], []>} : vector<16x1024xbf16>, vector<1024x64xbf16>, vector<16x64xf32> -> vector<16x64xf32>
    %c0_3 = arith.constant 0 : index
    %c0_4 = arith.constant 0 : index
    %3 = vector.load %arg4[%c0_3, %c0_4] : memref<1x64xf32, #tpu.memory_space<vmem>>, vector<1x64xf32>
    %4 = vector.broadcast %3 : vector<1x64xf32> to vector<16x64xf32>
    %5 = arith.addf %2, %4 : vector<16x64xf32>
    %c0_5 = arith.constant 0 : index
    %c0_6 = arith.constant 0 : index
    %6 = vector.load %arg1[%c0_5, %c0_6] : memref<16x1xi32, #tpu.memory_space<vmem>>, vector<16x1xi32>
    %7 = tpu.iota {dimensions = array<i32: 1>} : vector<16x8xi32>
    %8 = vector.broadcast %6 : vector<16x1xi32> to vector<16x8xi32>
    %9 = arith.cmpi eq, %7, %8 : vector<16x8xi32>
    %10 = arith.extui %9 : vector<16x8xi1> to vector<16x8xi32>
    %11 = arith.sitofp %10 : vector<16x8xi32> to vector<16x8xf32>
    %c0_7 = arith.constant 0 : index
    %c0_8 = arith.constant 0 : index
    %12 = vector.load %arg5[%c0_7, %c0_8] : memref<8x256xf32, #tpu.memory_space<vmem>>, vector<8x256xf32>
    %cst_9 = arith.constant dense<0.000000e+00> : vector<16x256xf32>
    %13 = tpu.matmul %11, %12, %cst_9 {dimension_numbers = #tpu.dot_dimension_numbers<[1], [0], [0], [1], [0, 0, 1, 1], [], []>, precision = #tpu.contract_precision<fp32>} : vector<16x8xf32>, vector<8x256xf32>, vector<16x256xf32> -> vector<16x256xf32>
    %c0_10 = arith.constant 0 : index
    %c0_11 = arith.constant 0 : index
    %14 = vector.load %arg6[%c0_10, %c0_11] : memref<7x256xf32, #tpu.memory_space<vmem>>, vector<7x256xf32>
    %15 = vector.extract_strided_slice %14 {offsets = [0, 0], sizes = [1, 256], strides = [1, 1]} : vector<7x256xf32> to vector<1x256xf32>
    %16 = vector.extract_strided_slice %14 {offsets = [1, 0], sizes = [1, 256], strides = [1, 1]} : vector<7x256xf32> to vector<1x256xf32>
    %17 = vector.broadcast %16 : vector<1x256xf32> to vector<16x256xf32>
    %18 = arith.mulf %13, %17 : vector<16x256xf32>
    %19 = vector.broadcast %15 : vector<1x256xf32> to vector<16x256xf32>
    %20 = arith.addf %19, %18 : vector<16x256xf32>
    %21 = arith.mulf %13, %13 : vector<16x256xf32>
    %22 = vector.extract_strided_slice %14 {offsets = [2, 0], sizes = [1, 256], strides = [1, 1]} : vector<7x256xf32> to vector<1x256xf32>
    %23 = vector.broadcast %22 : vector<1x256xf32> to vector<16x256xf32>
    %24 = arith.mulf %21, %23 : vector<16x256xf32>
    %25 = arith.addf %20, %24 : vector<16x256xf32>
    %26 = arith.mulf %21, %13 : vector<16x256xf32>
    %27 = vector.extract_strided_slice %14 {offsets = [3, 0], sizes = [1, 256], strides = [1, 1]} : vector<7x256xf32> to vector<1x256xf32>
    %28 = vector.broadcast %27 : vector<1x256xf32> to vector<16x256xf32>
    %29 = arith.mulf %26, %28 : vector<16x256xf32>
    %30 = arith.addf %25, %29 : vector<16x256xf32>
    %31 = arith.mulf %26, %13 : vector<16x256xf32>
    %32 = vector.extract_strided_slice %14 {offsets = [4, 0], sizes = [1, 256], strides = [1, 1]} : vector<7x256xf32> to vector<1x256xf32>
    %33 = vector.broadcast %32 : vector<1x256xf32> to vector<16x256xf32>
    %34 = arith.mulf %31, %33 : vector<16x256xf32>
    %35 = arith.addf %30, %34 : vector<16x256xf32>
    %36 = arith.mulf %31, %13 : vector<16x256xf32>
    %37 = vector.extract_strided_slice %14 {offsets = [5, 0], sizes = [1, 256], strides = [1, 1]} : vector<7x256xf32> to vector<1x256xf32>
    %38 = vector.broadcast %37 : vector<1x256xf32> to vector<16x256xf32>
    %39 = arith.mulf %36, %38 : vector<16x256xf32>
    %40 = arith.addf %35, %39 : vector<16x256xf32>
    %41 = arith.mulf %36, %13 : vector<16x256xf32>
    %42 = vector.extract_strided_slice %14 {offsets = [6, 0], sizes = [1, 256], strides = [1, 1]} : vector<7x256xf32> to vector<1x256xf32>
    %43 = vector.broadcast %42 : vector<1x256xf32> to vector<16x256xf32>
    %44 = arith.mulf %41, %43 : vector<16x256xf32>
    %45 = arith.addf %40, %44 : vector<16x256xf32>
    %c0_12 = arith.constant 0 : index
    %c0_13 = arith.constant 0 : index
    %46 = vector.load %arg7[%c0_12, %c0_13] : memref<64x256xf32, #tpu.memory_space<vmem>>, vector<64x256xf32>
    %cst_14 = arith.constant dense<0.000000e+00> : vector<16x256xf32>
    %47 = tpu.matmul %5, %46, %cst_14 {dimension_numbers = #tpu.dot_dimension_numbers<[1], [0], [0], [1], [0, 0, 1, 1], [], []>, precision = #tpu.contract_precision<fp32>} : vector<16x64xf32>, vector<64x256xf32>, vector<16x256xf32> -> vector<16x256xf32>
    %48 = arith.mulf %45, %47 : vector<16x256xf32>
    %49 = vector.extract_strided_slice %48 {offsets = [0, 0], sizes = [16, 64], strides = [1, 1]} : vector<16x256xf32> to vector<16x64xf32>
    %50 = vector.extract_strided_slice %48 {offsets = [0, 64], sizes = [16, 64], strides = [1, 1]} : vector<16x256xf32> to vector<16x64xf32>
    %51 = arith.addf %49, %50 : vector<16x64xf32>
    %52 = vector.extract_strided_slice %48 {offsets = [0, 128], sizes = [16, 64], strides = [1, 1]} : vector<16x256xf32> to vector<16x64xf32>
    %53 = arith.addf %51, %52 : vector<16x64xf32>
    %54 = vector.extract_strided_slice %48 {offsets = [0, 192], sizes = [16, 64], strides = [1, 1]} : vector<16x256xf32> to vector<16x64xf32>
    %55 = arith.addf %53, %54 : vector<16x64xf32>
    %56 = arith.truncf %55 : vector<16x64xf32> to vector<16x64xbf16>
    %c0_15 = arith.constant 0 : index
    %c0_16 = arith.constant 0 : index
    %57 = vector.load %arg8[%c0_15, %c0_16] : memref<64x1024xbf16, #tpu.memory_space<vmem>>, vector<64x1024xbf16>
    %cst_17 = arith.constant dense<0.000000e+00> : vector<16x1024xf32>
    %58 = tpu.matmul %56, %57, %cst_17 {dimension_numbers = #tpu.dot_dimension_numbers<[1], [0], [0], [1], [0, 0, 1, 1], [], []>} : vector<16x64xbf16>, vector<64x1024xbf16>, vector<16x1024xf32> -> vector<16x1024xf32>
    %c0_18 = arith.constant 0 : index
    %c0_19 = arith.constant 0 : index
    %59 = vector.load %arg9[%c0_18, %c0_19] : memref<1x1024xf32, #tpu.memory_space<vmem>>, vector<1x1024xf32>
    %60 = vector.broadcast %59 : vector<1x1024xf32> to vector<16x1024xf32>
    %61 = arith.addf %58, %60 : vector<16x1024xf32>
    %c0_20 = arith.constant 0 : index
    %c0_21 = arith.constant 0 : index
    %62 = vector.load %arg10[%c0_20, %c0_21] : memref<16x1024xf32, #tpu.memory_space<vmem>>, vector<16x1024xf32>
    tpu.vector_store %arg10[%c0_20, %c0_21], %61 {strides = array<i32>} : memref<16x1024xf32, #tpu.memory_space<vmem>>, vector<16x1024xf32>,
    return
  }
  func.func @transform_0(%arg0: i32) -> (i32, i32) {
    %c0_i32 = arith.constant 0 : i32
    %c0_i32_0 = arith.constant 0 : i32
    return %arg0, %c0_i32 : i32, i32
  }
  func.func @transform_1(%arg0: i32) -> (i32, i32) {
    %c0_i32 = arith.constant 0 : i32
    %c0_i32_0 = arith.constant 0 : i32
    return %arg0, %c0_i32 : i32, i32
  }
  func.func @transform_2(%arg0: i32) -> (i32, i32) {
    %c0_i32 = arith.constant 0 : i32
    %c0_i32_0 = arith.constant 0 : i32
    %c0_i32_1 = arith.constant 0 : i32
    return %c0_i32, %c0_i32_0 : i32, i32
  }
  func.func @transform_3(%arg0: i32) -> (i32, i32) {
    %c0_i32 = arith.constant 0 : i32
    %c0_i32_0 = arith.constant 0 : i32
    %c0_i32_1 = arith.constant 0 : i32
    return %c0_i32, %c0_i32_0 : i32, i32
  }
  func.func @transform_4(%arg0: i32) -> (i32, i32) {
    %c0_i32 = arith.constant 0 : i32
    %c0_i32_0 = arith.constant 0 : i32
    %c0_i32_1 = arith.constant 0 : i32
    return %c0_i32, %c0_i32_0 : i32, i32
  }
  func.func @transform_5(%arg0: i32) -> (i32, i32) {
    %c0_i32 = arith.constant 0 : i32
    %c0_i32_0 = arith.constant 0 : i32
    %c0_i32_1 = arith.constant 0 : i32
    return %c0_i32, %c0_i32_0 : i32, i32
  }
  func.func @transform_6(%arg0: i32) -> (i32, i32) {
    %c0_i32 = arith.constant 0 : i32
    %c0_i32_0 = arith.constant 0 : i32
    %c0_i32_1 = arith.constant 0 : i32
    return %c0_i32, %c0_i32_0 : i32, i32
  }
  func.func @transform_7(%arg0: i32) -> (i32, i32) {
    %c0_i32 = arith.constant 0 : i32
    %c0_i32_0 = arith.constant 0 : i32
    %c0_i32_1 = arith.constant 0 : i32
    return %c0_i32, %c0_i32_0 : i32, i32
  }
  func.func @transform_8(%arg0: i32) -> (i32, i32) {
    %c0_i32 = arith.constant 0 : i32
    %c0_i32_0 = arith.constant 0 : i32
    %c0_i32_1 = arith.constant 0 : i32
    return %c0_i32, %c0_i32_0 : i32, i32
  }
  func.func @transform_9(%arg0: i32) -> (i32, i32) {
    %c0_i32 = arith.constant 0 : i32
    %c0_i32_0 = arith.constant 0 : i32
    return %arg0, %c0_i32 : i32, i32
  }
}

</mosaic_0001>

<bundles_post_ra>
// kernel: tile.9
= control target key start
LH: loop header
LB: loop body
LE: loop exit
PB: predicated region body
PF: predicated region fallthrough
CT: control target
= control target key end

     0   :  { %s58_s22 = smov 3  ;;  %s70_s23 = smov 3  ;;  %vm43_vm0 = vcmask 523264   ;;  %vm91_vm1 = vcmask 1047556   ;;  %vm95_vm2 = vcmask 1048064   ;;  %s205_s0 = inlined_call_operand.vmem [shape: f32[8,4,64], index: 0, kind: input, shape index: {}]   ;;  %s206_s1 = inlined_call_operand.vmem [shape: f32[8,256], index: 1, kind: output, shape index: {}]  }
   0x1   :  { %v114_v0 = vld [vmem:[%s205_s0 + $0x1c] sm:$0xf]  ;;  %v115_v1 = vld [vmem:[%s205_s0 + $0x18] sm:$0xf]  ;;  %v116_v2 = vld [vmem:[%s205_s0 + $0x14] sm:$0xf] }
   0x2   :  { %9 = vst [vmem:[#allocation0 + $0x38] sm:$0xf] %v114_v0  ;;  %14 = vst [vmem:[#allocation0 + $0x30] sm:$0xf] %v115_v1  ;;  %v117_v3 = vld [vmem:[%s205_s0 + $0x10] sm:$0xf] }
   0x3   :  { %19 = vst [vmem:[#allocation0 + $0x28] sm:$0xf] %v116_v2  ;;  %v118_v4 = vld [vmem:[%s205_s0 + $0xc] sm:$0xf]  ;;  %v119_v5 = vld [vmem:[%s205_s0 + $0x8] sm:$0xf] }
   0x4   :  { %24 = vst [vmem:[#allocation0 + $0x20] sm:$0xf] %v117_v3  ;;  %29 = vst [vmem:[#allocation0 + $0x18] sm:$0xf] %v118_v4  ;;  %v120_v6 = vld [vmem:[%s205_s0 + $0x4] sm:$0xf] }
   0x5   :  { %34 = vst [vmem:[#allocation0 + $0x10] sm:$0xf] %v119_v5  ;;  %v39_v7 = vld [vmem:[%s205_s0] sm:$0xf]  ;;  %38 = vst [vmem:[#allocation0 + $0x8] sm:$0xf] %v120_v6 }
   0x6   :  { %40 = vst [vmem:[#allocation0] sm:$0xf] %v39_v7  ;;  %s52_s0 = smov 3  ;;  %s76_s24 = smov 3 }
   0x7   :  { %s64_s25 = smov 3  ;;  %s82_s26 = smov 3 }
   0x8   :  { %s41_s27 = smov 3  ;;  %s46_s28 = smov 3 }
   0x9   :  { %v77_v9 = vld [vmem:[#allocation0 + $0x30] ss:$2 sm:%s76_s24]   ;;  %s130_s16 = smov 64  }
   0xa   :  { %v71_v8 = vld [vmem:[#allocation0 + $0x28] ss:$2 sm:%s70_s23]   ;;  %v83_v10 = vld [vmem:[#allocation0 + $0x38] ss:$2 sm:%s82_s26]  }
   0xb   :  { %v59_v12 = vld [vmem:[#allocation0 + $0x18] ss:$2 sm:%s58_s22]   ;;  %125 = vst.msk [vmem:[%s206_s1 + $0x5] ss:$8 sm:$0x3] %vm43_vm0, %v71_v8  }
   0xc   :  { %v53_v11 = vld [vmem:[#allocation0 + $0x10] ss:$2 sm:%s52_s0]   ;;  %v65_v13 = vld [vmem:[#allocation0 + $0x20] ss:$2 sm:%s64_s25]  }
   0xd   :  { %126 = vst.msk [vmem:[%s206_s1 + $0x6] ss:$8 sm:$0x3] %vm43_vm0, %v77_v9   ;;  %127 = vst.msk [vmem:[%s206_s1 + $0x7] ss:$8 sm:$0x3] %vm43_vm0, %v83_v10  }
   0xe   :  { %v42_v14 = vld [vmem:[#allocation0] ss:$2 sm:%s41_s27]   ;;  %122 = vst.msk [vmem:[%s206_s1 + $0x2] ss:$8 sm:$0x3] %vm43_vm0, %v53_v11  }
   0xf   :  { %v47_v15 = vld [vmem:[#allocation0 + $0x8] ss:$2 sm:%s46_s28]   ;;  %123 = vst.msk [vmem:[%s206_s1 + $0x3] ss:$8 sm:$0x3] %vm43_vm0, %v59_v12  }
  0x10   :  { %124 = vst.msk [vmem:[%s206_s1 + $0x4] ss:$8 sm:$0x3] %vm43_vm0, %v65_v13   ;;  %44 = vst.msk [vmem:[%s206_s1] ss:$8 sm:$0x3] %vm43_vm0, %v42_v14  }
  0x11   :  { %121 = vst.msk [vmem:[%s206_s1 + $0x1] ss:$8 sm:$0x3] %vm43_vm0, %v47_v15   ;;  %v88_v16 = vld [vmem:[#allocation0 + $0x1] ss:$8 sm:$0xf]  }
  0x12   :  { %v90_v17 = vld [vmem:[#allocation0 + $0x1] ss:$8 sm:$0xf0]   ;;  %v98_v19 = vld [vmem:[#allocation0 + $0x3] ss:$8 sm:$0xf]  }
  0x13   :  { %v92_v18 = vsel %vm91_vm1, %v90_v17, %v88_v16  ;;  %v100_v20 = vld [vmem:[#allocation0 + $0x3] ss:$8 sm:$0xf0]  }
  0x14   :  { %93 = vrot.lane.b32.xlu0 %v92_v18, %s130_s16  ;;  %v102_v21 = vsel %vm91_vm1, %v100_v20, %v98_v19 }
  0x18   :  { %103 = vrot.lane.b32.xlu0 %v102_v21, %s130_s16 }
  0x86   :  { %v94_v22 = vpop.permute.xlu0 %93  }
  0x87   :  { %96 = vst.msk [vmem:[%s206_s1] sm:$0xff] %vm95_vm2, %v94_v22  }
  0x8a   :  { %v104_v23 = vpop.permute.xlu0 %103  }
  0x8b   :  { %128 = vst.msk [vmem:[%s206_s1 + $0x8] sm:$0xff] %vm95_vm2, %v104_v23  }

// kernel: lie_action_forward.1
= control target key start
LH: loop header
LB: loop body
LE: loop exit
PB: predicated region body
PF: predicated region fallthrough
CT: control target
= control target key end

     0   :  { %v3865_v1 = vmov 0   ;;  %vm782_vm0 = vcmask 64512   ;;  %vm1445_vm3 = vcmask 523264   ;;  %s3854_s2 = inlined_call_operand.vmem [shape: bf16[1024,64], index: 2, kind: input, shape index: {}]   ;;  %s3855_s1 = inlined_call_operand.vmem [shape: bf16[16,1024], index: 1, kind: input, shape index: {}]   ;;  %s3856_s0 = inlined_call_operand.vmem [shape: s32[16,1], index: 0, kind: input, shape index: {}]   ;;  %s3857_s4 = inlined_call_operand.vmem [shape: f32[8,256], index: 4, kind: input, shape index: {}]   ;;  %s3858_s6 = inlined_call_operand.vmem [shape: f32[64,256], index: 6, kind: input, shape index: {}]   ;;  %s3859_s3 = inlined_call_operand.vmem [shape: f32[1,64], index: 3, kind: input, shape index: {}]   ;;  %s3860_s7 = inlined_call_operand.vmem [shape: bf16[64,1024], index: 7, kind: input, shape index: {}]   ;;  %s3861_s5 = inlined_call_operand.vmem [shape: f32[7,256], index: 5, kind: input, shape index: {}]   ;;  %s3862_s8 = inlined_call_operand.vmem [shape: f32[1,1024], index: 8, kind: input, shape index: {}]   ;;  %s3863_s9 = inlined_call_operand.vmem [shape: f32[16,1024], index: 9, kind: output, shape index: {}]  }
   0x1   :  { %v2813_v0 = vld [vmem:[%s3854_s2 + $0x78] sm:$0xff]   ;;  %2812 = vset.pattern.permute.xlu0 %v3865_v1  ;;  %v2817_v5 = vld [vmem:[%s3854_s2 + $0x70] sm:$0xff]   ;;  %v2821_v9 = vld [vmem:[%s3854_s2 + $0x68] sm:$0xff]  }
   0x2   :  { %v2814_v2 = vld [vmem:[%s3854_s2 + $0xf8] sm:$0xff]   ;;  %2721 = vmatprep.subr.bf16.mxu0 %v2813_v0  ;;  %v2818_v6 = vld [vmem:[%s3854_s2 + $0xf0] sm:$0xff]   ;;  %v2822_v10 = vld [vmem:[%s3854_s2 + $0xe8] sm:$0xff]  }
   0x3   :  { %v2815_v3 = vld [vmem:[%s3854_s2 + $0x38] sm:$0xff]   ;;  %2743 = vmatprep.subr.bf16.mxu1 %v2814_v2  ;;  %v2819_v7 = vld [vmem:[%s3854_s2 + $0x30] sm:$0xff]   ;;  %v2823_v11 = vld [vmem:[%s3854_s2 + $0x28] sm:$0xff]  }
   0x4   :  { %v2816_v4 = vld [vmem:[%s3854_s2 + $0xb8] sm:$0xff]   ;;  %2722 = vmatpush3.bf16.msra.mxu0 %v2815_v3  ;;  %v2820_v8 = vld [vmem:[%s3854_s2 + $0xb0] sm:$0xff]   ;;  %v2824_v12 = vld [vmem:[%s3854_s2 + $0xa8] sm:$0xff]  }
   0x5   :  { %2744 = vmatpush3.bf16.msra.mxu1 %v2816_v4  ;;  %2723 = vmatprep.subr.bf16.mxu0 %v2817_v5  ;;  %v2825_v13 = vld [vmem:[%s3854_s2 + $0x60] sm:$0xff]   ;;  %v2829_v17 = vld [vmem:[%s3854_s2 + $0x58] sm:$0xff]   ;;  %v2833_v21 = vld [vmem:[%s3854_s2 + $0x50] sm:$0xff]  }
   0x6   :  { %2745 = vmatprep.subr.bf16.mxu1 %v2818_v6  ;;  %v2826_v14 = vld [vmem:[%s3854_s2 + $0xe0] sm:$0xff]   ;;  %v2830_v18 = vld [vmem:[%s3854_s2 + $0xd8] sm:$0xff]   ;;  %v2834_v22 = vld [vmem:[%s3854_s2 + $0xd0] sm:$0xff]  }
   0x7   :  { %v2827_v15 = vld [vmem:[%s3854_s2 + $0x20] sm:$0xff]   ;;  %v2831_v19 = vld [vmem:[%s3854_s2 + $0x18] sm:$0xff]   ;;  %v2835_v23 = vld [vmem:[%s3854_s2 + $0x10] sm:$0xff]  }
   0x8   :  { %2724 = vmatpush3.bf16.msra.mxu0 %v2819_v7  ;;  %v2828_v16 = vld [vmem:[%s3854_s2 + $0xa0] sm:$0xff]   ;;  %v2832_v20 = vld [vmem:[%s3854_s2 + $0x98] sm:$0xff]   ;;  %v2836_v24 = vld [vmem:[%s3854_s2 + $0x90] sm:$0xff]  }
   0x9   :  { %2746 = vmatpush3.bf16.msra.mxu1 %v2820_v8  ;;  %2725 = vmatprep.subr.bf16.mxu0 %v2821_v9  ;;  %v2837_v25 = vld [vmem:[%s3854_s2 + $0x48] sm:$0xff]   ;;  %v2841_v29 = vld [vmem:[%s3854_s2 + $0x40] sm:$0xff]   ;;  %v2845_v41 = vld [vmem:[%s3854_s2 + $0x178] sm:$0xff]  }
   0xa   :  { %2747 = vmatprep.subr.bf16.mxu1 %v2822_v10  ;;  %v2838_v26 = vld [vmem:[%s3854_s2 + $0xc8] sm:$0xff]   ;;  %v2842_v30 = vld [vmem:[%s3854_s2 + $0xc0] sm:$0xff]   ;;  %v2846_v42 = vld [vmem:[%s3854_s2 + $0x1f8] sm:$0xff]  }
   0xb   :  { %v2839_v27 = vld [vmem:[%s3854_s2 + $0x8] sm:$0xff]   ;;  %v2843_v31 = vld [vmem:[%s3854_s2] sm:$0xff]   ;;  %v2847_v43 = vld [vmem:[%s3854_s2 + $0x138] sm:$0xff]  }
   0xc   :  { %2726 = vmatpush3.bf16.msra.mxu0 %v2823_v11  ;;  %v2840_v28 = vld [vmem:[%s3854_s2 + $0x88] sm:$0xff]   ;;  %v2844_v32 = vld [vmem:[%s3854_s2 + $0x80] sm:$0xff]   ;;  %v2848_v44 = vld [vmem:[%s3854_s2 + $0x1b8] sm:$0xff]  }
   0xd   :  { %2748 = vmatpush3.bf16.msra.mxu1 %v2824_v12  ;;  %2727 = vmatprep.subr.bf16.mxu0 %v2825_v13  ;;  %v33_v33 = vld [vmem:[%s3855_s1] sm:$0xff]  ;;  %v34_v35 = vld [vmem:[%s3855_s1 + $0x8] sm:$0xff]  ;;  %v2849_v45 = vld [vmem:[%s3854_s2 + $0x170] sm:$0xff]  }
   0xe   :  { %2749 = vmatprep.subr.bf16.mxu1 %v2826_v14  ;;  %v37_v34 = vld [vmem:[%s3855_s1 + $0x20] sm:$0xff]  ;;  %v38_v38 = vld [vmem:[%s3855_s1 + $0x28] sm:$0xff]  ;;  %v2850_v46 = vld [vmem:[%s3854_s2 + $0x1f0] sm:$0xff]  }
   0xf   :  { %v2605_v36 = vcombine.low %v33_v33, %v37_v34  ;;  %v2606_v37 = vcombine.high %v33_v33, %v37_v34  ;;  %v2607_v39 = vcombine.low %v34_v35, %v38_v38  ;;  %v2608_v40 = vcombine.high %v34_v35, %v38_v38  ;;  %v2851_v47 = vld [vmem:[%s3854_s2 + $0x130] sm:$0xff]   ;;  %v2853_v49 = vld [vmem:[%s3854_s2 + $0x168] sm:$0xff]   ;;  %v2857_v53 = vld [vmem:[%s3854_s2 + $0x160] sm:$0xff]  }
  0x10   :  { %2728 = vmatpush3.bf16.msra.mxu0 %v2827_v15  ;;  %v2852_v48 = vld [vmem:[%s3854_s2 + $0x1b0] sm:$0xff]   ;;  %v2854_v50 = vld [vmem:[%s3854_s2 + $0x1e8] sm:$0xff]   ;;  %v2858_v54 = vld [vmem:[%s3854_s2 + $0x1e0] sm:$0xff]   ;;  %v3864_v34 = vlaneseq }
  0x11   :  { %2750 = vmatpush3.bf16.msra.mxu1 %v2828_v16  ;;  %2729 = vmatprep.subr.bf16.mxu0 %v2829_v17  ;;  %v2855_v51 = vld [vmem:[%s3854_s2 + $0x128] sm:$0xff]   ;;  %v2859_v55 = vld [vmem:[%s3854_s2 + $0x120] sm:$0xff]   ;;  %v2861_v57 = vld [vmem:[%s3854_s2 + $0x158] sm:$0xff]  }
  0x12   :  { %2751 = vmatprep.subr.bf16.mxu1 %v2830_v18  ;;  %632 = vmatprep.mubr.bf16.mxu0 %v2606_v37  ;;  %v2856_v52 = vld [vmem:[%s3854_s2 + $0x1a8] sm:$0xff]   ;;  %v2860_v56 = vld [vmem:[%s3854_s2 + $0x1a0] sm:$0xff]   ;;  %v2862_v58 = vld [vmem:[%s3854_s2 + $0x1d8] sm:$0xff]  }
  0x13   :  { %673 = vmatprep.mubr.bf16.mxu1 %v2608_v40  ;;  %v2863_v59 = vld [vmem:[%s3854_s2 + $0x118] sm:$0xff]   ;;  %v2865_v61 = vld [vmem:[%s3854_s2 + $0x150] sm:$0xff]   ;;  %v2869_v2 = vld [vmem:[%s3854_s2 + $0x148] sm:$0xff]  }
  0x14   :  { %2730 = vmatpush3.bf16.msra.mxu0 %v2831_v19  ;;  %v2864_v60 = vld [vmem:[%s3854_s2 + $0x198] sm:$0xff]   ;;  %v2866_v62 = vld [vmem:[%s3854_s2 + $0x1d0] sm:$0xff]   ;;  %v2870_v3 = vld [vmem:[%s3854_s2 + $0x1c8] sm:$0xff]  }
  0x15   :  { %2752 = vmatpush3.bf16.msra.mxu1 %v2832_v20  ;;  %2731 = vmatprep.subr.bf16.mxu0 %v2833_v21  ;;  %v2867_v63 = vld [vmem:[%s3854_s2 + $0x110] sm:$0xff]   ;;  %v2871_v4 = vld [vmem:[%s3854_s2 + $0x108] sm:$0xff]   ;;  %v2873_v6 = vld [vmem:[%s3854_s2 + $0x140] sm:$0xff]  }
  0x16   :  { %2753 = vmatprep.subr.bf16.mxu1 %v2834_v22  ;;  %v2868_v0 = vld [vmem:[%s3854_s2 + $0x190] sm:$0xff]   ;;  %v2872_v5 = vld [vmem:[%s3854_s2 + $0x188] sm:$0xff]   ;;  %v2874_v7 = vld [vmem:[%s3854_s2 + $0x1c0] sm:$0xff]   ;;  %v2878_v22 = vmov 0.0  }
  0x17   :  { %v2875_v8 = vld [vmem:[%s3854_s2 + $0x100] sm:$0xff]   ;;  %v35_v10 = vld [vmem:[%s3855_s1 + $0x10] sm:$0xff]  ;;  %v36_v14 = vld [vmem:[%s3855_s1 + $0x18] sm:$0xff] }
  0x18   :  { %2732 = vmatpush3.bf16.msra.mxu0 %v2835_v23  ;;  %v2876_v9 = vld [vmem:[%s3854_s2 + $0x180] sm:$0xff]   ;;  %v39_v11 = vld [vmem:[%s3855_s1 + $0x30] sm:$0xff]  ;;  %v40_v15 = vld [vmem:[%s3855_s1 + $0x38] sm:$0xff]  ;;  %s2879_s1 = smov 64  }
  0x19   :  { %2754 = vmatpush3.bf16.msra.mxu1 %v2836_v24  ;;  %2733 = vmatprep.subr.bf16.mxu0 %v2837_v25  ;;  %v2609_v12 = vcombine.low %v35_v10, %v39_v11  ;;  %v2610_v13 = vcombine.high %v35_v10, %v39_v11  ;;  %v764_v16 = vld [vmem:[%s3856_s0] sm:$0xff]  ;;  %v2611_v17 = vcombine.low %v36_v14, %v40_v15  ;;  %v765_v19 = vld [vmem:[%s3856_s0 + $0x8] sm:$0xff]  ;;  %v1444_v33 = vld [vmem:[%s3858_s6 + $0x78] sm:$0xff] }
  0x1a   :  { %2755 = vmatprep.subr.bf16.mxu1 %v2838_v26  ;;  %v2612_v18 = vcombine.high %v36_v14, %v40_v15  ;;  %769 = vperm.xlu0 %2812, %v764_v16   ;;  %v781_v20 = vld [vmem:[%s3857_s4 + $0x8] sm:$0xff]  ;;  %v780_v21 = vld [vmem:[%s3857_s4] sm:$0xff]  ;;  %v3181_v35 = vand.u32 4294901760, %v1444_v33  ;;  %v1443_v37 = vld [vmem:[%s3858_s6 + $0x70] sm:$0xff] }
  0x1b   :  { %v819_v23 = vand.u32 4294901760, %v781_v20  ;;  %v3160_v24 = vand.u32 4294901760, %v780_v21  ;;  %v1442_v40 = vld [vmem:[%s3858_s6 + $0x68] sm:$0xff]  ;;  %v1433_v10 = vld [vmem:[%s3858_s6 + $0x20] sm:$0xff]  ;;  %v1432_v15 = vld [vmem:[%s3858_s6 + $0x18] sm:$0xff] }
  0x1c   :  { %2734 = vmatpush3.bf16.msra.mxu0 %v2839_v27  ;;  %v3188_v38 = vsub.f32 %v1444_v33, %v3181_v35 }
  0x1d   :  { %2756 = vmatpush3.bf16.msra.mxu1 %v2840_v28  ;;  %2735 = vmatprep.subr.bf16.mxu0 %v2841_v29  ;;  %v3164_v25 = vsub.f32 %v780_v21, %v3160_v24  ;;  %v3166_v26 = vsub.f32 %v781_v20, %v819_v23  ;;  %v1431_v20 = vld [vmem:[%s3858_s6 + $0x10] sm:$0xff] }
  0x1e   :  { %2757 = vmatprep.subr.bf16.mxu1 %v2842_v30  ;;  %772 = vperm.xlu0 %2812, %v765_v19  }
  0x1f   :  { %v910_v27 = vand.u32 4294901760, %v3166_v26  ;;  %v916_v28 = vand.u32 4294901760, %v3164_v25 }
  0x20   :  { %2736 = vmatpush3.bf16.msra.mxu0 %v2843_v31 }
  0x21   :  { %2758 = vmatpush3.bf16.msra.mxu1 %v2844_v32  ;;  %2765 = vmatprep.subr.bf16.mxu0 %v2845_v41  ;;  %v911_v29 = vsub.f32 %v3166_v26, %v910_v27  ;;  %v917_v30 = vsub.f32 %v3164_v25, %v916_v28  ;;  %v3193_v41 = vand.u32 4294901760, %v1443_v37 }
  0x22   :  { %2787 = vmatprep.subr.bf16.mxu1 %v2846_v42  ;;  %v1441_v42 = vld [vmem:[%s3858_s6 + $0x60] sm:$0xff] }
  0x23   :  { %633 = vmatmul.mubr.bf16.vlgmr.msra.gmra.mxu0 %v2605_v36  ;;  %v912_v31 = vand.u32 4294901760, %v911_v29  ;;  %v918_v32 = vand.u32 4294901760, %v917_v30  ;;  %v767_v36 = vand.u32 127, %v3864_v34  ;;  %v3300_v30 = vand.u32 4294901760, %v1433_v10 }
  0x24   :  { %674 = vmatmul.mubr.bf16.vlgmr.msra.gmra.mxu1 %v2607_v39  ;;  %2766 = vmatpush3.bf16.msra.mxu0 %v2847_v43 }
  0x25   :  { %2788 = vmatpush3.bf16.msra.mxu1 %v2848_v44  ;;  %2767 = vmatprep.subr.bf16.mxu0 %v2849_v45  ;;  %v1440_v44 = vld [vmem:[%s3858_s6 + $0x58] sm:$0xff] }
  0x26   :  { %2789 = vmatprep.subr.bf16.mxu1 %v2850_v46  ;;  %714 = vmatprep.mubr.bf16.mxu0 %v2610_v13  ;;  %v1573_v46 = vand.u32 4294901760, %v3188_v38 }
  0x27   :  { %755 = vmatprep.mubr.bf16.mxu1 %v2612_v18 }
  0x28   :  { %2768 = vmatpush3.bf16.msra.mxu0 %v2851_v47  ;;  %v3209_v47 = vand.u32 4294901760, %v1442_v40 }
  0x29   :  { %2790 = vmatpush3.bf16.msra.mxu1 %v2852_v48  ;;  %2769 = vmatprep.subr.bf16.mxu0 %v2853_v49  ;;  %v1439_v48 = vld [vmem:[%s3858_s6 + $0x50] sm:$0xff] }
  0x2a   :  { %2791 = vmatprep.subr.bf16.mxu1 %v2854_v50 }
  0x2c   :  { %2770 = vmatpush3.bf16.msra.mxu0 %v2855_v51  ;;  %v3218_v51 = vand.u32 4294901760, %v1441_v42 }
  0x2d   :  { %2792 = vmatpush3.bf16.msra.mxu1 %v2856_v52  ;;  %2771 = vmatprep.subr.bf16.mxu0 %v2857_v53  ;;  %v1438_v52 = vld [vmem:[%s3858_s6 + $0x48] sm:$0xff]  ;;  %v3224_v53 = vsub.f32 %v1443_v37, %v3193_v41  ;;  %v3314_v37 = vand.u32 4294901760, %v1432_v15 }
  0x2e   :  { %2793 = vmatprep.subr.bf16.mxu1 %v2858_v54  ;;  %v3226_v54 = vand.u32 4294901760, %v1440_v44 }
  0x30   :  { %2772 = vmatpush3.bf16.msra.mxu0 %v2859_v55  ;;  %v1437_v55 = vld [vmem:[%s3858_s6 + $0x40] sm:$0xff] }
  0x31   :  { %2794 = vmatpush3.bf16.msra.mxu1 %v2860_v56  ;;  %2773 = vmatprep.subr.bf16.mxu0 %v2861_v57 }
  0x32   :  { %2795 = vmatprep.subr.bf16.mxu1 %v2862_v58  ;;  %v3235_v58 = vand.u32 4294901760, %v1439_v48 }
  0x34   :  { %2774 = vmatpush3.bf16.msra.mxu0 %v2863_v59  ;;  %v1436_v59 = vld [vmem:[%s3858_s6 + $0x38] sm:$0xff]  ;;  %v3278_v13 = vsub.f32 %v1439_v48, %v3235_v58 }
  0x35   :  { %2796 = vmatpush3.bf16.msra.mxu1 %v2864_v60  ;;  %2775 = vmatprep.subr.bf16.mxu0 %v2865_v61  ;;  %v1574_v61 = vsub.f32 %v3188_v38, %v1573_v46 }
  0x36   :  { %2797 = vmatprep.subr.bf16.mxu1 %v2866_v62  ;;  %v3248_v62 = vsub.f32 %v1442_v40, %v3209_v47 }
  0x37   :  { %v1575_v16 = vand.u32 4294901760, %v1574_v61  ;;  %v3353_v61 = vsub.f32 %v1432_v15, %v3314_v37 }
  0x38   :  { %2776 = vmatpush3.bf16.msra.mxu0 %v2867_v63  ;;  %v3250_v63 = vand.u32 4294901760, %v1438_v52 }
  0x39   :  { %2798 = vmatpush3.bf16.msra.mxu1 %v2868_v0  ;;  %2777 = vmatprep.subr.bf16.mxu0 %v2869_v2  ;;  %v1435_v0 = vld [vmem:[%s3858_s6 + $0x30] sm:$0xff] }
  0x3a   :  { %2799 = vmatprep.subr.bf16.mxu1 %v2870_v3  ;;  %v3280_v14 = vand.u32 4294901760, %v1435_v0  ;;  %v3287_v18 = vsub.f32 %v1438_v52, %v3250_v63 }
  0x3c   :  { %2778 = vmatpush3.bf16.msra.mxu0 %v2871_v4  ;;  %v3260_v4 = vsub.f32 %v1441_v42, %v3218_v51  ;;  %v3877_v42 = vand.u32 4294901760, %v3278_v13 }
  0x3d   :  { %2800 = vmatpush3.bf16.msra.mxu1 %v2872_v5  ;;  %2779 = vmatprep.subr.bf16.mxu0 %v2873_v6  ;;  %v3262_v5 = vand.u32 4294901760, %v1437_v55  ;;  %v1434_v6 = vld [vmem:[%s3858_s6 + $0x28] sm:$0xff] }
  0x3e   :  { %2801 = vmatprep.subr.bf16.mxu1 %v2874_v7  ;;  %v1579_v7 = vand.u32 4294901760, %v3224_v53  ;;  %v3289_v19 = vand.u32 4294901760, %v1434_v6 }
  0x3f   :  { %v3298_v29 = vsub.f32 %v1437_v55, %v3262_v5  ;;  %v3343_v55 = vsub.f32 %v1433_v10, %v3300_v30 }
  0x40   :  { %2780 = vmatpush3.bf16.msra.mxu0 %v2875_v8  ;;  %v3269_v8 = vsub.f32 %v1440_v44, %v3226_v54  ;;  %v3324_v44 = vsub.f32 %v1435_v0, %v3280_v14 }
  0x41   :  { %2802 = vmatpush3.bf16.msra.mxu1 %v2876_v9  ;;  %820 = vmatprep.subr.mxu0 %v819_v23  ;;  %v3271_v9 = vand.u32 4294901760, %v1436_v59  ;;  %v3875_v52 = vand.u32 4294901760, %v3298_v29 }
  0x42   :  { %913 = vmatprep.subr.mxu1 %v912_v31  ;;  %v1430_v31 = vld [vmem:[%s3858_s6 + $0x8] sm:$0xff]  ;;  %v3878_v33 = vand.u32 4294901760, %v3269_v8 }
  0x43   :  { %715 = vmatmul.mubr.bf16.vlgmr.msra.gmra.mxu0 %v2609_v12 }
  0x44   :  { %756 = vmatmul.mubr.bf16.vlgmr.msra.gmra.mxu1 %v2611_v17  ;;  %855 = vmatprep.mubr.f32.mxu0 %v2878_v22  ;;  %v1585_v17 = vand.u32 4294901760, %v3248_v62 }
  0x45   :  { %952 = vmatprep.mubr.f32.mxu1 %v2878_v22  ;;  %822 = vmatpush1.msra.mxu0 %v3160_v24 }
  0x46   :  { %999 = vmatprep.subr.mxu0 %v3166_v26  ;;  %919 = vmatpush1.msra.mxu1 %v918_v32  ;;  %v1580_v32 = vsub.f32 %v3224_v53, %v1579_v7  ;;  %v1586_v48 = vsub.f32 %v3248_v62, %v1585_v17  ;;  %v3333_v26 = vsub.f32 %v1434_v6, %v3289_v19  ;;  %v3873_v6 = vand.u32 4294901760, %v3324_v44 }
  0x47   :  { %1083 = vmatprep.subr.mxu1 %v819_v23 }
  0x48   :  { %v1581_v0 = vand.u32 4294901760, %v1580_v32  ;;  %v3867_v15 = vand.u32 4294901760, %v3333_v26  ;;  %v3872_v32 = vand.u32 4294901760, %v3343_v55 }
  0x95   :  { %v770_v39 = vpop.permute.xlu0 %769 }
  0x96   :  { %vm774_vm1 = vcmp.eq.s32.totalorder %v767_v36, %v770_v39  ;;  %v1429_v39 = vld [vmem:[%s3858_s6] sm:$0xff] }
  0x97   :  { %v3199_v43 = vsel %vm774_vm1, 1.0, %v2878_v22 }
  0x98   :  { %v784_v45 = vsel %vm782_vm0, %v3199_v43, 0  ;;  %2679 = vmatmul.mubr.msk.f32.vlgmr.msra.gmra.mxu1 %vm782_vm0, %v3199_v43 }
  0x99   :  { %v3214_v49 = vsub.f32 %v784_v45, %v784_v45  ;;  %v773_v50 = vpop.permute.xlu0 %772  ;;  %959 = vmatprep.mubr.f32.mxu1 %v2878_v22  ;;  %1085 = vmatpush1.msra.mxu1 %v3160_v24  ;;  %v3326_v45 = vand.u32 4294901760, %v1431_v20 }
  0x9a   :  { %vm775_vm2 = vcmp.eq.s32.totalorder %v767_v36, %v773_v50  ;;  %1253 = vmatprep.subr.mxu1 %v819_v23  ;;  %v1591_v23 = vand.u32 4294901760, %v3260_v4  ;;  %v3312_v36 = vsub.f32 %v1436_v59, %v3271_v9  ;;  %v3876_v50 = vand.u32 4294901760, %v3287_v18 }
  0x9b   :  { %v3232_v56 = vsel %vm775_vm2, 1.0, %v2878_v22  ;;  %v858_v57 = vand.u32 4294901760, %v3214_v49  ;;  %v1598_v59 = vsub.f32 %v3269_v8, %v3878_v33  ;;  %v3360_v10 = vsub.f32 %v1431_v20, %v3326_v45 }
  0x9c   :  { %v787_v60 = vsel %vm782_vm0, %v3232_v56, 0  ;;  %2680 = vmatmul.mubr.msk.f32.gmra.mxu1 %vm782_vm0, %v3232_v56  ;;  %v1616_v20 = vsub.f32 %v3298_v29, %v3875_v52 }
  0x9d   :  { %v3255_v2 = vsub.f32 %v787_v60, %v787_v60  ;;  %v859_v3 = vsub.f32 %v3214_v49, %v858_v57  ;;  %1118 = vmatprep.mubr.f32.mxu1 %v2878_v22  ;;  %v3874_v60 = vand.u32 4294901760, %v3312_v36  ;;  %v3870_v34 = vand.u32 4294901760, %v3360_v10 }
  0x9f   :  { %v860_v11 = vand.u32 4294901760, %v859_v3  ;;  %v869_v12 = vand.u32 4294901760, %v3255_v2  ;;  %v1604_v3 = vsub.f32 %v3278_v13, %v3877_v42 }
  0xa0   :  { %1122 = vmatmul.mubr.f32.vlgmr.msra.gmra.mxu1 %v858_v57  ;;  %v3345_v57 = vand.u32 4294901760, %v1429_v39 }
  0xa1   :  { %861 = vmatmul.mubr.f32.vlgmr.msra.gmra.mxu0 %v860_v11  ;;  %v870_v21 = vsub.f32 %v3255_v2, %v869_v12  ;;  %1127 = vmatprep.mubr.f32.mxu1 %v2878_v22  ;;  %v1587_v11 = vand.u32 4294901760, %v1586_v48  ;;  %v3871_v48 = vand.u32 4294901760, %v3353_v61 }
  0xa2   :  { %866 = vmatprep.mubr.f32.mxu0 %v2878_v22  ;;  %1002 = vmatpush1.msra.mxu0 %v3164_v25 }
  0xa3   :  { %v871_v40 = vand.u32 4294901760, %v870_v21  ;;  %1170 = vmatprep.subr.mxu0 %v910_v27  ;;  %1255 = vmatpush1.msra.mxu1 %v3160_v24  ;;  %v3335_v27 = vand.u32 4294901760, %v1430_v31  ;;  %v1592_v24 = vsub.f32 %v3260_v4, %v1591_v23 }
  0xa4   :  { %1131 = vmatmul.mubr.f32.gmra.mxu1 %v869_v12  ;;  %1576 = vmatprep.subr.mxu1 %v1575_v16  ;;  %v1610_v12 = vsub.f32 %v3287_v18, %v3876_v50 }
  0xa5   :  { %872 = vmatmul.mubr.f32.gmra.mxu0 %v871_v40  ;;  %1288 = vmatprep.mubr.f32.mxu1 %v2878_v22  ;;  %v3369_v16 = vsub.f32 %v1430_v31, %v3335_v27  ;;  %v1593_v21 = vand.u32 4294901760, %v1592_v24  ;;  %v3378_v40 = vsub.f32 %v1429_v39, %v3345_v57  ;;  %v1599_v31 = vand.u32 4294901760, %v1598_v59 }
  0xa6   :  { %1035 = vmatprep.mubr.f32.mxu0 %v2878_v22  ;;  %v1605_v24 = vand.u32 4294901760, %v1604_v3  ;;  %v1628_v39 = vsub.f32 %v3324_v44, %v3873_v6  ;;  %v1611_v25 = vand.u32 4294901760, %v1610_v12  ;;  %v1640_v3 = vsub.f32 %v3343_v55, %v3872_v32 }
  0xa7   :  { %v3869_v59 = vand.u32 4294901760, %v3369_v16  ;;  %v3868_v1 = vand.u32 4294901760, %v3378_v40  ;;  %v1646_v12 = vsub.f32 %v3353_v61, %v3871_v48 }
  0xa8   :  { %2683 = vmatmul.mubr.msk.f32.vlgmr.msra.gmra.mxu1 %vm782_vm0, %v3199_v43 }
  0xa9   :  { %1038 = vmatmul.mubr.f32.vlgmr.msra.gmra.mxu0 %v3214_v49  ;;  %1295 = vmatprep.mubr.f32.mxu1 %v2878_v22  ;;  %v1622_v49 = vsub.f32 %v3312_v36, %v3874_v60 }
  0xaa   :  { %1043 = vmatprep.mubr.f32.mxu0 %v2878_v22  ;;  %1174 = vmatpush1.msra.mxu0 %v916_v28  ;;  %v1634_v28 = vsub.f32 %v3333_v26, %v3867_v15  ;;  %v1629_v15 = vand.u32 4294901760, %v1628_v39 }
  0xab   :  { %1582 = vmatpush1.msra.mxu1 %v1581_v0  ;;  %1469 = vmatprep.subr.mxu0 %v3181_v35  ;;  %v1617_v0 = vand.u32 4294901760, %v1616_v20  ;;  %v1658_v20 = vsub.f32 %v3369_v16, %v3869_v59 }
  0xac   :  { %2684 = vmatmul.mubr.msk.f32.gmra.mxu1 %vm782_vm0, %v3232_v56  ;;  %1588 = vmatprep.subr.mxu1 %v1587_v11  ;;  %v1623_v11 = vand.u32 4294901760, %v1622_v49  ;;  %v1664_v49 = vsub.f32 %v3378_v40, %v3868_v1 }
  0xad   :  { %1046 = vmatmul.mubr.f32.gmra.mxu0 %v3255_v2  ;;  %1594 = vmatpush1.msra.mxu1 %v1593_v21  ;;  %v1652_v2 = vsub.f32 %v3360_v10, %v3870_v34  ;;  %v1635_v21 = vand.u32 4294901760, %v1634_v28 }
  0xae   :  { %1207 = vmatprep.mubr.f32.mxu0 %v2878_v22  ;;  %1600 = vmatprep.subr.mxu1 %v1599_v31  ;;  %v1641_v31 = vand.u32 4294901760, %v1640_v3 }
  0xaf   :  { %1606 = vmatpush1.msra.mxu1 %v1605_v24  ;;  %1699 = vmatprep.mubr.f32.mxu1 %v2878_v22  ;;  %v1647_v24 = vand.u32 4294901760, %v1646_v12  ;;  %v1653_v39 = vand.u32 4294901760, %v1652_v2  ;;  %v2604_v2 = vld [vmem:[%s3859_s3] ss:$0 sm:$0xff] }
  0xb0   :  { %1612 = vmatprep.subr.mxu1 %v1611_v25  ;;  %v1659_v25 = vand.u32 4294901760, %v1658_v20 }
  0xb1   :  { %2681 = vmatmul.mubr.msk.f32.vlgmr.msra.gmra.mxu0 %vm782_vm0, %v3199_v43  ;;  %1618 = vmatpush1.msra.mxu1 %v1617_v0  ;;  %v1665_v43 = vand.u32 4294901760, %v1664_v49 }
  0xb2   :  { %1214 = vmatprep.mubr.f32.mxu0 %v2878_v22  ;;  %1624 = vmatprep.subr.mxu1 %v1623_v11 }
  0xb3   :  { %1471 = vmatpush1.msra.mxu0 %v3193_v41  ;;  %1630 = vmatpush1.msra.mxu1 %v1629_v15 }
  0xb4   :  { %1473 = vmatprep.subr.mxu0 %v3209_v47  ;;  %1636 = vmatprep.subr.mxu1 %v1635_v21 }
  0xb5   :  { %2682 = vmatmul.mubr.msk.f32.gmra.mxu0 %vm782_vm0, %v3232_v56  ;;  %1642 = vmatpush1.msra.mxu1 %v1641_v31 }
  0xb6   :  { %1475 = vmatpush1.msra.mxu0 %v3218_v51  ;;  %1648 = vmatprep.subr.mxu1 %v1647_v24 }
  0xb7   :  { %1477 = vmatprep.subr.mxu0 %v3226_v54  ;;  %1654 = vmatpush1.msra.mxu1 %v1653_v39 }
  0xb8   :  { %1479 = vmatpush1.msra.mxu0 %v3235_v58  ;;  %1660 = vmatprep.subr.mxu1 %v1659_v25 }
  0xb9   :  { %1481 = vmatprep.subr.mxu0 %v3250_v63  ;;  %1666 = vmatpush1.msra.mxu1 %v1665_v43 }
  0xba   :  { %1483 = vmatpush1.msra.mxu0 %v3262_v5  ;;  %1844 = vmatprep.subr.mxu1 %v3181_v35 }
  0xbb   :  { %1485 = vmatprep.subr.mxu0 %v3271_v9  ;;  %1532 = vmatprep.mubr.f32.mxu0 %v2878_v22 }
  0xbc   :  { %1487 = vmatpush1.msra.mxu0 %v3280_v14 }
  0xbd   :  { %1489 = vmatprep.subr.mxu0 %v3289_v19 }
  0xbe   :  { %1491 = vmatpush1.msra.mxu0 %v3300_v30 }
  0xbf   :  { %1493 = vmatprep.subr.mxu0 %v3314_v37 }
  0xc0   :  { %1495 = vmatpush1.msra.mxu0 %v3326_v45 }
  0xc1   :  { %1497 = vmatprep.subr.mxu0 %v3335_v27 }
  0xc2   :  { %1499 = vmatpush1.msra.mxu0 %v3345_v57 }
  0xc3   :  { %1732 = vmatprep.subr.mxu0 %v3188_v38  ;;  %v3880_v38 = vand.u32 4294901760, %v3278_v13 }
  0xe3   :  { %v2737_v56 = vpop.f32.mrf.mxu0 }
  0xe4   :  { %v2759_v15 = vpop.f32.mrf.mxu1 }
  0xe5   :  { %v2738_v28 = vpop.f32.mrf.mxu0 }
  0xe6   :  { %v2760_v0 = vpop.f32.mrf.mxu1  ;;  %v2739_v11 = vadd.f32 %v2738_v28, %v2737_v56 }
  0xe7   :  { %v2740_v3 = vpop.f32.mrf.mxu0  ;;  %v2761_v31 = vadd.f32 %v2760_v0, %v2759_v15 }
  0xe8   :  { %v2762_v12 = vpop.f32.mrf.mxu1  ;;  %v635_v20 = vadd.f32 %v2739_v11, %v2604_v2 }
  0xe9   :  { %v2741_v21 = vpop.f32.mrf.mxu0 }
  0xea   :  { %v2742_v49 = vadd.f32 %v2741_v21, %v2740_v3  ;;  %v2763_v24 = vpop.f32.mrf.mxu1  ;;  %v676_v1 = vadd.f32 %v2761_v31, %v635_v20 }
  0xeb   :  { %v2764_v6 = vadd.f32 %v2763_v24, %v2762_v12 }
  0xec   :  { %v638_v59 = vadd.f32 %v2742_v49, %v2604_v2 }
  0xee   :  { %v679_v50 = vadd.f32 %v2764_v6, %v638_v59 }
 0x103   :  { %v2781_v39 = vpop.f32.mrf.mxu0 }
 0x104   :  { %v2803_v25 = vpop.f32.mrf.mxu1 }
 0x105   :  { %v2782_v43 = vpop.f32.mrf.mxu0 }
 0x106   :  { %v2783_v34 = vadd.f32 %v2782_v43, %v2781_v39  ;;  %v2804_v48 = vpop.f32.mrf.mxu1 }
 0x107   :  { %v2784_v32 = vpop.f32.mrf.mxu0  ;;  %v2805_v28 = vadd.f32 %v2804_v48, %v2803_v25 }
 0x108   :  { %v717_v56 = vadd.f32 %v2783_v34, %v676_v1  ;;  %v2806_v60 = vpop.f32.mrf.mxu1 }
 0x109   :  { %v2785_v52 = vpop.f32.mrf.mxu0 }
 0x10a   :  { %v758_v42 = vadd.f32 %v2805_v28, %v717_v56  ;;  %v2786_v11 = vadd.f32 %v2785_v52, %v2784_v32  ;;  %v2807_v15 = vpop.f32.mrf.mxu1 }
 0x10b   :  { %v2808_v21 = vadd.f32 %v2807_v15, %v2806_v60 }
 0x10c   :  { %v1447_v0 = vsel %vm1445_vm3, %v758_v42, 0  ;;  %v720_v3 = vadd.f32 %v2786_v11, %v679_v50 }
 0x10d   :  { %v3444_v33 = vand.u32 4294901760, %v1447_v0 }
 0x10e   :  { %v761_v2 = vadd.f32 %v2808_v21, %v720_v3 }
 0x10f   :  { %v1534_v20 = vsub.f32 %v1447_v0, %v3444_v33  ;;  %1701 = vmatmul.mubr.f32.vlgmr.msra.gmra.mxu1 %v3444_v33  ;;  %v3892_v0 = vlaneseq }
 0x110   :  { %v1450_v1 = vsel %vm1445_vm3, %v761_v2, 0  ;;  %1846 = vmatpush1.msra.mxu1 %v3193_v41  ;;  %1706 = vmatprep.mubr.f32.mxu1 %v2878_v22 }
 0x111   :  { %v1535_v34 = vand.u32 4294901760, %v1534_v20  ;;  %v3451_v52 = vand.u32 4294901760, %v1450_v1  ;;  %1848 = vmatprep.subr.mxu1 %v3209_v47  ;;  %v3572_v3 = vshrl.u32 %v3892_v0, 7 }
 0x112   :  { %1850 = vmatpush1.msra.mxu1 %v3218_v51 }
 0x113   :  { %v1536_v42 = vsub.f32 %v1534_v20, %v1535_v34  ;;  %v1545_v50 = vsub.f32 %v1450_v1, %v3451_v52  ;;  %1852 = vmatprep.subr.mxu1 %v3226_v54  ;;  %1708 = vmatmul.mubr.f32.gmra.mxu1 %v3451_v52 }
 0x114   :  { %1854 = vmatpush1.msra.mxu1 %v3235_v58  ;;  %1907 = vmatprep.mubr.f32.mxu1 %v2878_v22 }
 0x115   :  { %v1537_v60 = vand.u32 4294901760, %v1536_v42  ;;  %1856 = vmatprep.subr.mxu1 %v3250_v63  ;;  %v1546_v6 = vand.u32 4294901760, %v1545_v50 }
 0x116   :  { %1858 = vmatpush1.msra.mxu1 %v3262_v5 }
 0x117   :  { %1860 = vmatprep.subr.mxu1 %v3271_v9  ;;  %1538 = vmatmul.mubr.f32.vlgmr.msra.gmra.mxu0 %v1537_v60  ;;  %v1547_v32 = vsub.f32 %v1545_v50, %v1546_v6  ;;  %v3575_v60 = vsub.s32 1, %v3572_v3 }
 0x118   :  { %1735 = vmatpush1.msra.mxu0 %v3224_v53  ;;  %1862 = vmatpush1.msra.mxu1 %v3280_v14  ;;  %v3885_v53 = vand.u32 4294901760, %v3333_v26 }
 0x119   :  { %1738 = vmatprep.subr.mxu0 %v3248_v62  ;;  %1864 = vmatprep.subr.mxu1 %v3289_v19  ;;  %v1548_v48 = vand.u32 4294901760, %v1547_v32  ;;  %v3888_v62 = vand.u32 4294901760, %v3360_v10 }
 0x11a   :  { %1741 = vmatpush1.msra.mxu0 %v3260_v4  ;;  %1866 = vmatpush1.msra.mxu1 %v3300_v30  ;;  %v3890_v4 = vand.u32 4294901760, %v3369_v16 }
 0x11b   :  { %1543 = vmatprep.mubr.f32.mxu0 %v2878_v22  ;;  %1744 = vmatprep.subr.mxu0 %v3269_v8 }
 0x11c   :  { %1868 = vmatprep.subr.mxu1 %v3314_v37  ;;  %1549 = vmatmul.mubr.f32.gmra.mxu0 %v1548_v48 }
 0x11d   :  { %1747 = vmatpush1.msra.mxu0 %v3278_v13  ;;  %1870 = vmatpush1.msra.mxu1 %v3326_v45 }
 0x11e   :  { %1750 = vmatprep.subr.mxu0 %v3287_v18  ;;  %1872 = vmatprep.subr.mxu1 %v3335_v27 }
 0x11f   :  { %1753 = vmatpush1.msra.mxu0 %v3298_v29  ;;  %1874 = vmatpush1.msra.mxu1 %v3345_v57 }
 0x120   :  { %1756 = vmatprep.subr.mxu0 %v3312_v36  ;;  %1911 = vmatmul.mubr.f32.vlgmr.msra.gmra.mxu1 %v1535_v34 }
 0x121   :  { %2070 = vmatprep.subr.mxu1 %v3181_v35  ;;  %1759 = vmatpush1.msra.mxu0 %v3324_v44  ;;  %v3879_v35 = vand.u32 4294901760, %v3269_v8  ;;  %v2203_v8 = vld [vmem:[%s3860_s7 + $0xe0] sm:$0xff] }
 0x122   :  { %2072 = vmatpush1.msra.mxu1 %v3193_v41  ;;  %1762 = vmatprep.subr.mxu0 %v3333_v26  ;;  %v3881_v41 = vand.u32 4294901760, %v3287_v18  ;;  %v2195_v18 = vld [vmem:[%s3860_s7 + $0xa0] sm:$0xff] }
 0x123   :  { %2074 = vmatprep.subr.mxu1 %v3209_v47  ;;  %1765 = vmatpush1.msra.mxu0 %v3343_v55  ;;  %v3883_v47 = vand.u32 4294901760, %v3312_v36 }
 0x124   :  { %1916 = vmatprep.mubr.f32.mxu1 %v2878_v22  ;;  %2076 = vmatpush1.msra.mxu1 %v3218_v51  ;;  %v3884_v51 = vand.u32 4294901760, %v3324_v44 }
 0x125   :  { %1768 = vmatprep.subr.mxu0 %v3353_v61  ;;  %1920 = vmatmul.mubr.f32.gmra.mxu1 %v1546_v6  ;;  %v3580_v6 = vld [vmem:[%s3861_s5] sm:$0x7f] }
 0x126   :  { %2078 = vmatprep.subr.mxu1 %v3226_v54  ;;  %1771 = vmatpush1.msra.mxu0 %v3360_v10  ;;  %v3886_v54 = vand.u32 4294901760, %v3343_v55 }
 0x127   :  { %2080 = vmatpush1.msra.mxu1 %v3235_v58  ;;  %1774 = vmatprep.subr.mxu0 %v3369_v16  ;;  %v3887_v58 = vand.u32 4294901760, %v3353_v61 }
 0x128   :  { %2082 = vmatprep.subr.mxu1 %v3250_v63  ;;  %1777 = vmatpush1.msra.mxu0 %v3378_v40  ;;  %v3889_v63 = vmov 0  }
 0x129   :  { %1810 = vmatprep.mubr.f32.mxu0 %v2878_v22  ;;  %2084 = vmatpush1.msra.mxu1 %v3262_v5  ;;  %v3891_v5 = vand.u32 4294901760, %v3378_v40 }
 0x12a   :  { %1813 = vmatmul.mubr.f32.vlgmr.msra.gmra.mxu0 %v1534_v20  ;;  %1945 = vmatprep.subr.mxu0 %v1573_v46  ;;  %v3882_v46 = vand.u32 4294901760, %v3298_v29 }
 0x12b   :  { %2086 = vmatprep.subr.mxu1 %v3271_v9  ;;  %1949 = vmatpush1.msra.mxu0 %v1579_v7  ;;  %v2199_v7 = vld [vmem:[%s3860_s7 + $0xc0] sm:$0xff]  ;;  %v2200_v9 = vld [vmem:[%s3860_s7 + $0xc8] sm:$0xff] }
 0x12c   :  { %2088 = vmatpush1.msra.mxu1 %v3280_v14  ;;  %1953 = vmatprep.subr.mxu0 %v1585_v17  ;;  %v2709_v13 = vcombine.low %v2199_v7, %v2203_v8  ;;  %v2710_v14 = vcombine.high %v2199_v7, %v2203_v8  ;;  %v2191_v17 = vld [vmem:[%s3860_s7 + $0x80] sm:$0xff] }
 0x12d   :  { %2090 = vmatprep.subr.mxu1 %v3289_v19  ;;  %1818 = vmatprep.mubr.f32.mxu0 %v2878_v22  ;;  %v2702_v29 = vcombine.high %v2191_v17, %v2195_v18 }
 0x12e   :  { %1957 = vmatpush1.msra.mxu0 %v1591_v23  ;;  %2092 = vmatpush1.msra.mxu1 %v3300_v30  ;;  %v2192_v30 = vld [vmem:[%s3860_s7 + $0x88] sm:$0xff] }
 0x12f   :  { %1821 = vmatmul.mubr.f32.gmra.mxu0 %v1545_v50  ;;  %1961 = vmatprep.subr.mxu0 %v3879_v35 }
 0x130   :  { %2094 = vmatprep.subr.mxu1 %v3314_v37  ;;  %1965 = vmatpush1.msra.mxu0 %v3880_v38  ;;  %v2701_v37 = vcombine.low %v2191_v17, %v2195_v18  ;;  %v3583_v38 = vsub.s32 0, %v3572_v3 }
 0x131   :  { %2096 = vmatpush1.msra.mxu1 %v3326_v45  ;;  %1969 = vmatprep.subr.mxu0 %v3881_v41 }
 0x132   :  { %2098 = vmatprep.subr.mxu1 %v3335_v27  ;;  %1973 = vmatpush1.msra.mxu0 %v3882_v46  ;;  %v1320_v7 = vrot.slane %v3580_v6, %v3583_v38 }
 0x133   :  { %2100 = vmatpush1.msra.mxu1 %v3345_v57  ;;  %2133 = vmatprep.mubr.f32.mxu1 %v2878_v22 }
 0x134   :  { %1977 = vmatprep.subr.mxu0 %v3883_v47  ;;  %2135 = vmatmul.mubr.f32.vlgmr.msra.gmra.mxu1 %v3444_v33 }
 0x135   :  { %1981 = vmatpush1.msra.mxu0 %v3884_v51  ;;  %2140 = vmatprep.mubr.f32.mxu1 %v2878_v22  ;;  %v1308_v51 = vrot.slane %v3580_v6, %v3575_v60 }
 0x136   :  { %1985 = vmatprep.subr.mxu0 %v3885_v53  ;;  %2038 = vmatprep.mubr.f32.mxu0 %v2878_v22  ;;  %v3590_v53 = vsub.s32 2, %v3572_v3 }
 0x137   :  { %1989 = vmatpush1.msra.mxu0 %v3886_v54 }
 0x138   :  { %1993 = vmatprep.subr.mxu0 %v3887_v58  ;;  %2142 = vmatmul.mubr.f32.gmra.mxu1 %v3451_v52 }
 0x139   :  { %1997 = vmatpush1.msra.mxu0 %v3888_v62  ;;  %2487 = vmatprep.mubr.bf16.mxu1 %v3889_v63 }
 0x13a   :  { %2001 = vmatprep.subr.mxu0 %v3890_v4 }
 0x13b   :  { %2005 = vmatpush1.msra.mxu0 %v3891_v5  ;;  %v3597_v5 = vld [vmem:[%s3861_s5 + $0x8] sm:$0x7f] }
 0x13c   :  { %2040 = vmatmul.mubr.f32.vlgmr.msra.gmra.mxu0 %v3444_v33  ;;  %v2196_v33 = vld [vmem:[%s3860_s7 + $0xa8] sm:$0xff]  ;;  %2420 = vmatprep.subr.bf16.mxu0 %v2710_v14  ;;  %v1336_v14 = vrot.slane %v3580_v6, %v3590_v53 }
 0x13d   :  { %2045 = vmatprep.mubr.f32.mxu0 %v2878_v22  ;;  %v2204_v22 = vld [vmem:[%s3860_s7 + $0xe8] sm:$0xff]  ;;  %v2704_v36 = vcombine.high %v2192_v30, %v2196_v33  ;;  %2421 = vmatpush1.bf16.msra.mxu0 %v2709_v13  ;;  %v2703_v44 = vcombine.low %v2192_v30, %v2196_v33  ;;  %v3620_v33 = vsub.s32 4, %v3572_v3 }
 0x13e   :  { %v2711_v19 = vcombine.low %v2200_v9, %v2204_v22  ;;  %v2712_v23 = vcombine.high %v2200_v9, %v2204_v22  ;;  %2422 = vmatprep.subr.bf16.mxu0 %v2702_v29  ;;  %v3607_v22 = vsub.s32 3, %v3572_v3 }
 0x140   :  { %2047 = vmatmul.mubr.f32.gmra.mxu0 %v3451_v52  ;;  %2463 = vmatprep.subr.bf16.mxu1 %v2712_v23  ;;  %v1312_v23 = vrot.slane %v3597_v5, %v3575_v60 }
 0x141   :  { %2444 = vmatprep.mubr.bf16.mxu0 %v3889_v63  ;;  %2464 = vmatpush1.bf16.msra.mxu1 %v2711_v19 }
 0x142   :  { %2465 = vmatprep.subr.bf16.mxu1 %v2704_v36  ;;  %2423 = vmatpush1.bf16.msra.mxu0 %v2701_v37 }
 0x145   :  { %2466 = vmatpush1.bf16.msra.mxu1 %v2703_v44 }
 0x158   :  { %v955_v45 = vpop.f32.mrf.mxu1 }
 0x15a   :  { %v957_v27 = vpop.f32.mrf.mxu1 }
 0x15c   :  { %v962_v57 = vpop.f32.mrf.mxu1 }
 0x15e   :  { %v964_v10 = vpop.f32.mrf.mxu1 }
 0x160   :  { %v1123_v40 = vpop.f32.mrf.mxu1 }
 0x161   :  { %v862_v26 = vpop.f32.mrf.mxu0 }
 0x162   :  { %v1125_v12 = vpop.f32.mrf.mxu1  ;;  %v956_v24 = vadd.f32 %v955_v45, %v862_v26  ;;  %v1356_v45 = vrot.slane %v3580_v6, %v3607_v22 }
 0x163   :  { %v864_v55 = vpop.f32.mrf.mxu0 }
 0x164   :  { %v1132_v49 = vpop.f32.mrf.mxu1  ;;  %v958_v11 = vadd.f32 %v957_v27, %v864_v55 }
 0x165   :  { %v873_v61 = vpop.f32.mrf.mxu0 }
 0x166   :  { %v1134_v25 = vpop.f32.mrf.mxu1  ;;  %v963_v15 = vadd.f32 %v962_v57, %v873_v61  ;;  %v1324_v57 = vrot.slane %v3597_v5, %v3583_v38 }
 0x167   :  { %v875_v16 = vpop.f32.mrf.mxu0 }
 0x168   :  { %v1291_v28 = vpop.f32.mrf.mxu1  ;;  %v965_v48 = vadd.f32 %v964_v10, %v875_v16  ;;  %v1340_v10 = vrot.slane %v3597_v5, %v3590_v53 }
 0x169   :  { %v1039_v59 = vpop.f32.mrf.mxu0 }
 0x16a   :  { %v1040_v43 = vadd.f32 %v1039_v59, %v956_v24  ;;  %v1293_v20 = vpop.f32.mrf.mxu1 }
 0x16b   :  { %v1041_v31 = vpop.f32.mrf.mxu0 }
 0x16c   :  { %v1124_v21 = vadd.f32 %v1123_v40, %v1040_v43  ;;  %v1042_v1 = vadd.f32 %v1041_v31, %v958_v11  ;;  %v1298_v50 = vpop.f32.mrf.mxu1  ;;  %v1376_v40 = vrot.slane %v3580_v6, %v3620_v33 }
 0x16d   :  { %v1047_v39 = vpop.f32.mrf.mxu0 }
 0x16e   :  { %v1048_v34 = vadd.f32 %v1047_v39, %v963_v15  ;;  %v1126_v32 = vadd.f32 %v1125_v12, %v1042_v1  ;;  %v1300_v47 = vpop.f32.mrf.mxu1  ;;  %v3643_v39 = vsub.s32 5, %v3572_v3 }
 0x16f   :  { %v1049_v56 = vpop.f32.mrf.mxu0 }
 0x170   :  { %v1133_v35 = vadd.f32 %v1132_v49, %v1048_v34  ;;  %v1050_v62 = vadd.f32 %v1049_v56, %v965_v48  ;;  %v1380_v48 = vrot.slane %v3597_v5, %v3620_v33 }
 0x171   :  { %v1210_v2 = vpop.f32.mrf.mxu0 }
 0x172   :  { %v1211_v52 = vadd.f32 %v1210_v2, %v1124_v21  ;;  %v1135_v29 = vadd.f32 %v1134_v25, %v1050_v62  ;;  %v1360_v25 = vrot.slane %v3597_v5, %v3607_v22 }
 0x173   :  { %v1212_v42 = vpop.f32.mrf.mxu0 }
 0x174   :  { %v3585_v41 = vadd.f32 %v1291_v28, %v1211_v52  ;;  %v1213_v54 = vadd.f32 %v1212_v42, %v1126_v32  ;;  %v3652_v28 = vsub.s32 6, %v3572_v3  ;;  %v1396_v32 = vrot.slane %v3580_v6, %v3643_v39 }
 0x175   :  { %v1217_v46 = vpop.f32.mrf.mxu0 }
 0x176   :  { %v1218_v4 = vadd.f32 %v1217_v46, %v1133_v35  ;;  %v1313_v9 = vmul.f32 %v1308_v51, %v3585_v41  ;;  %v1329_v13 = vmul.f32 %v3585_v41, %v3585_v41  ;;  %v3609_v17 = vadd.f32 %v1293_v20, %v1213_v54 }
 0x177   :  { %v1219_v8 = vpop.f32.mrf.mxu0  ;;  %v3667_v46 = vrot.slane %v3580_v6, %v3652_v28 }
 0x178   :  { %v3617_v30 = vadd.f32 %v1298_v50, %v1218_v4  ;;  %v1325_v36 = vadd.f32 %v1320_v7, %v1313_v9  ;;  %v1341_v37 = vmul.f32 %v1336_v14, %v1329_v13  ;;  %v1349_v44 = vmul.f32 %v1329_v13, %v3585_v41 }
 0x179   :  { %v1314_v55 = vmul.f32 %v1312_v23, %v3609_v17  ;;  %v1330_v61 = vmul.f32 %v3609_v17, %v3609_v17  ;;  %v1220_v16 = vadd.f32 %v1219_v8, %v1135_v29 }
 0x17a   :  { %v1315_v59 = vmul.f32 %v1308_v51, %v3617_v30  ;;  %v1331_v12 = vmul.f32 %v3617_v30, %v3617_v30  ;;  %v1345_v31 = vadd.f32 %v1341_v37, %v1325_v36  ;;  %v1361_v49 = vmul.f32 %v1356_v45, %v1349_v44 }
 0x17b   :  { %v1369_v24 = vmul.f32 %v1349_v44, %v3585_v41  ;;  %v1326_v11 = vadd.f32 %v1324_v57, %v1314_v55  ;;  %v1342_v15 = vmul.f32 %v1340_v10, %v1330_v61  ;;  %v1350_v0 = vmul.f32 %v1330_v61, %v3609_v17 }
 0x17c   :  { %v3655_v21 = vadd.f32 %v1300_v47, %v1220_v16  ;;  %v1327_v2 = vadd.f32 %v1320_v7, %v1315_v59  ;;  %v1343_v20 = vmul.f32 %v1336_v14, %v1331_v12  ;;  %v1351_v1 = vmul.f32 %v1331_v12, %v3617_v30 }
 0x17d   :  { %v1365_v52 = vadd.f32 %v1361_v49, %v1345_v31  ;;  %v1381_v42 = vmul.f32 %v1376_v40, %v1369_v24  ;;  %v1389_v50 = vmul.f32 %v1369_v24, %v3585_v41  ;;  %v1346_v47 = vadd.f32 %v1342_v15, %v1326_v11 }
 0x17e   :  { %v1362_v51 = vmul.f32 %v1360_v25, %v1350_v0  ;;  %v1370_v54 = vmul.f32 %v1350_v0, %v3609_v17  ;;  %v1347_v62 = vadd.f32 %v1343_v20, %v1327_v2  ;;  %v1363_v4 = vmul.f32 %v1356_v45, %v1351_v1 }
 0x17f   :  { %v1316_v7 = vmul.f32 %v1312_v23, %v3655_v21  ;;  %v1332_v8 = vmul.f32 %v3655_v21, %v3655_v21  ;;  %v1385_v14 = vadd.f32 %v1381_v42, %v1365_v52  ;;  %v1401_v29 = vmul.f32 %v1396_v32, %v1389_v50 }
 0x180   :  { %v1409_v36 = vmul.f32 %v1389_v50, %v3585_v41  ;;  %v1371_v6 = vmul.f32 %v1351_v1, %v3617_v30  ;;  %v1366_v37 = vadd.f32 %v1362_v51, %v1346_v47  ;;  %v1382_v44 = vmul.f32 %v1380_v48, %v1370_v54 }
 0x181   :  { %v3679_v55 = vrot.slane %v3597_v5, %v3643_v39  ;;  %v1390_v23 = vmul.f32 %v1370_v54, %v3609_v17  ;;  %v1328_v45 = vadd.f32 %v1324_v57, %v1316_v7  ;;  %v1344_v61 = vmul.f32 %v1340_v10, %v1332_v8 }
 0x182   :  { %v1352_v16 = vmul.f32 %v1332_v8, %v3655_v21  ;;  %v1405_v31 = vadd.f32 %v1401_v29, %v1385_v14  ;;  %v1421_v41 = vmul.f32 %v3667_v46, %v1409_v36  ;;  %v1367_v49 = vadd.f32 %v1363_v4, %v1347_v62  ;;  %v2188_v62 = vld [vmem:[%s3860_s7 + $0x68] sm:$0xff] }
 0x183   :  { %v1383_v24 = vmul.f32 %v1376_v40, %v1371_v6  ;;  %v1391_v11 = vmul.f32 %v1371_v6, %v3617_v30  ;;  %v1386_v15 = vadd.f32 %v1382_v44, %v1366_v37  ;;  %v3689_v0 = vrot.slane %v3597_v5, %v3652_v28  ;;  %v2183_v5 = vld [vmem:[%s3860_s7 + $0x40] sm:$0xff] }
 0x184   :  { %v1402_v10 = vmul.f32 %v3679_v55, %v1390_v23  ;;  %v1348_v2 = vadd.f32 %v1344_v61, %v1328_v45  ;;  %v1364_v20 = vmul.f32 %v1360_v25, %v1352_v16  ;;  %v3696_v42 = vadd.f32 %v1421_v41, %v1405_v31  ;;  %v2180_v45 = vld [vmem:[%s3860_s7 + $0x28] sm:$0xff] }
 0x185   :  { %v1410_v40 = vmul.f32 %v1390_v23, %v3609_v17  ;;  %v1387_v50 = vadd.f32 %v1383_v24, %v1367_v49  ;;  %v1372_v47 = vmul.f32 %v1352_v16, %v3655_v21  ;;  %v1403_v17 = vmul.f32 %v1396_v32, %v1391_v11 }
 0x186   :  { %v1411_v7 = vmul.f32 %v1391_v11, %v3617_v30  ;;  %v1406_v37 = vadd.f32 %v1402_v10, %v1386_v15  ;;  %v1368_v44 = vadd.f32 %v1364_v20, %v1348_v2  ;;  %v2175_v30 = vld [vmem:[%s3860_s7] sm:$0xff] }
 0x187   :  { %v1384_v32 = vmul.f32 %v1380_v48, %v1372_v47  ;;  %v1407_v31 = vadd.f32 %v1403_v17, %v1387_v50 }
 0x189   :  { %v1388_v10 = vadd.f32 %v1384_v32, %v1368_v44 }
 0x1cf   :  { %v3592_v58 = vpop.f32.mrf.mxu1 }
 0x1d1   :  { %v3611_v18 = vpop.f32.mrf.mxu1 }
 0x1d3   :  { %v3625_v26 = vpop.f32.mrf.mxu1 }
 0x1d5   :  { %v3647_v43 = vpop.f32.mrf.mxu1 }
 0x1d7   :  { %v3613_v19 = vpop.f32.mrf.mxu0 }
 0x1d8   :  { %v1703_v57 = vadd.f32 %v3592_v58, %v3613_v19  ;;  %v2187_v58 = vld [vmem:[%s3860_s7 + $0x60] sm:$0xff]  ;;  %v2184_v19 = vld [vmem:[%s3860_s7 + $0x48] sm:$0xff] }
 0x1d9   :  { %v3627_v27 = vpop.f32.mrf.mxu0  ;;  %v2694_v54 = vcombine.high %v2183_v5, %v2187_v58  ;;  %v2693_v8 = vcombine.low %v2183_v5, %v2187_v58  ;;  %v2695_v14 = vcombine.low %v2184_v19, %v2188_v62  ;;  %v2696_v29 = vcombine.high %v2184_v19, %v2188_v62 }
 0x1da   :  { %v1705_v25 = vadd.f32 %v3611_v18, %v3627_v27 }
 0x1db   :  { %2424 = vmatprep.subr.bf16.mxu0 %v2694_v54  ;;  %2467 = vmatprep.subr.bf16.mxu1 %v2696_v29 }
 0x1dc   :  { %v3649_v56 = vpop.f32.mrf.mxu0  ;;  %2425 = vmatpush1.bf16.msra.mxu0 %v2693_v8  ;;  %2468 = vmatpush1.bf16.msra.mxu1 %v2695_v14 }
 0x1dd   :  { %v1710_v36 = vadd.f32 %v3625_v26, %v3649_v56  ;;  %v2179_v26 = vld [vmem:[%s3860_s7 + $0x20] sm:$0xff]  ;;  %v2176_v56 = vld [vmem:[%s3860_s7 + $0x8] sm:$0xff] }
 0x1de   :  { %v1552_v35 = vpop.f32.mrf.mxu0  ;;  %v2685_v48 = vcombine.low %v2175_v30, %v2179_v26  ;;  %v2687_v41 = vcombine.low %v2176_v56, %v2180_v45  ;;  %v2688_v49 = vcombine.high %v2176_v56, %v2180_v45  ;;  %v2194_v45 = vld [vmem:[%s3860_s7 + $0x98] sm:$0xff] }
 0x1df   :  { %v1712_v18 = vadd.f32 %v3647_v43, %v1552_v35  ;;  %v2686_v35 = vcombine.high %v2175_v30, %v2179_v26 }
 0x1e0   :  { %v3658_v34 = vpop.f32.mrf.mxu1  ;;  %2469 = vmatprep.subr.bf16.mxu1 %v2688_v49 }
 0x1e1   :  { %2426 = vmatprep.subr.bf16.mxu0 %v2686_v35  ;;  %2470 = vmatpush1.bf16.msra.mxu1 %v2687_v41  ;;  %v2197_v35 = vld [vmem:[%s3860_s7 + $0xb0] sm:$0xff] }
 0x1e2   :  { %v3673_v9 = vpop.f32.mrf.mxu1  ;;  %2427 = vmatpush1.bf16.msra.mxu0 %v2685_v48 }
 0x1e5   :  { %v3683_v59 = vpop.f32.mrf.mxu1 }
 0x1e7   :  { %v3694_v1 = vpop.f32.mrf.mxu1 }
 0x1ea   :  { %v1814_v13 = vpop.f32.mrf.mxu0 }
 0x1eb   :  { %v1815_v51 = vadd.f32 %v1814_v13, %v1703_v57  ;;  %v1392_v13 = vmul.f32 %v1372_v47, %v3655_v21  ;;  %v2206_v47 = vld [vmem:[%s3860_s7 + $0xf8] sm:$0xff] }
 0x1ec   :  { %v1816_v12 = vpop.f32.mrf.mxu0 }
 0x1ed   :  { %v1817_v6 = vadd.f32 %v1816_v12, %v1705_v25  ;;  %v1913_v43 = vadd.f32 %v3658_v34, %v1815_v51  ;;  %v1422_v12 = vmul.f32 %v3689_v0, %v1410_v40  ;;  %v1423_v34 = vmul.f32 %v3667_v46, %v1411_v7  ;;  %v2205_v40 = vld [vmem:[%s3860_s7 + $0xf0] sm:$0xff]  ;;  %v2202_v46 = vld [vmem:[%s3860_s7 + $0xd8] sm:$0xff] }
 0x1ee   :  { %v1404_v2 = vmul.f32 %v3679_v55, %v1392_v13  ;;  %v1412_v20 = vmul.f32 %v1392_v13, %v3655_v21  ;;  %v2715_v51 = vcombine.low %v2202_v46, %v2206_v47  ;;  %v2716_v17 = vcombine.high %v2202_v46, %v2206_v47  ;;  %v2178_v46 = vld [vmem:[%s3860_s7 + $0x18] sm:$0xff] }
 0x1ef   :  { %v1822_v52 = vpop.f32.mrf.mxu0  ;;  %v1915_v15 = vadd.f32 %v3673_v9, %v1817_v6  ;;  %v1426_v19 = vadd.f32 %v1422_v12, %v1406_v37  ;;  %v1427_v8 = vadd.f32 %v1423_v34, %v1407_v31  ;;  %v2190_v34 = vld [vmem:[%s3860_s7 + $0x78] sm:$0xff] }
 0x1f0   :  { %v1823_v23 = vadd.f32 %v1822_v52, %v1710_v36  ;;  %v2201_v52 = vld [vmem:[%s3860_s7 + $0xd0] sm:$0xff]  ;;  %v1408_v14 = vadd.f32 %v1404_v2, %v1388_v10  ;;  %2549 = vmatprep.subr.bf16.mxu1 %v2716_v17  ;;  %v1424_v37 = vmul.f32 %v3689_v0, %v1412_v20 }
 0x1f1   :  { %v1824_v27 = vpop.f32.mrf.mxu0  ;;  %v2714_v21 = vcombine.high %v2201_v52, %v2205_v40  ;;  %v2713_v25 = vcombine.low %v2201_v52, %v2205_v40  ;;  %v2177_v52 = vld [vmem:[%s3860_s7 + $0x10] sm:$0xff] }
 0x1f2   :  { %v1825_v24 = vadd.f32 %v1824_v27, %v1712_v18  ;;  %v1922_v55 = vadd.f32 %v3683_v59, %v1823_v23  ;;  %v2181_v40 = vld [vmem:[%s3860_s7 + $0x30] sm:$0xff] }
 0x1f3   :  { %2506 = vmatprep.subr.bf16.mxu0 %v2714_v21  ;;  %v2690_v21 = vcombine.high %v2177_v52, %v2181_v40 }
 0x1f4   :  { %v2136_v4 = vpop.f32.mrf.mxu1  ;;  %v1924_v7 = vadd.f32 %v3694_v1, %v1825_v24  ;;  %v1428_v1 = vadd.f32 %v1424_v37, %v1408_v14  ;;  %v2185_v24 = vld [vmem:[%s3860_s7 + $0x50] sm:$0xff] }
 0x1f6   :  { %v2138_v61 = vpop.f32.mrf.mxu1 }
 0x1f8   :  { %v2143_v5 = vpop.f32.mrf.mxu1 }
 0x1fa   :  { %v2145_v44 = vpop.f32.mrf.mxu1 }
 0x1fc   :  { %v2041_v16 = vpop.f32.mrf.mxu0 }
 0x1fd   :  { %v2042_v11 = vadd.f32 %v2041_v16, %v1913_v43  ;;  %v2193_v43 = vld [vmem:[%s3860_s7 + $0x90] sm:$0xff] }
 0x1fe   :  { %v2043_v57 = vpop.f32.mrf.mxu0  ;;  %v2706_v41 = vcombine.high %v2193_v43, %v2197_v35 }
 0x1ff   :  { %v2137_v9 = vadd.f32 %v2136_v4, %v2042_v11  ;;  %v2044_v50 = vadd.f32 %v2043_v57, %v1915_v15  ;;  %v2189_v11 = vld [vmem:[%s3860_s7 + $0x70] sm:$0xff]  ;;  %v2186_v15 = vld [vmem:[%s3860_s7 + $0x58] sm:$0xff]  ;;  %v2705_v57 = vcombine.low %v2193_v43, %v2197_v35 }
 0x200   :  { %v2048_v58 = vpop.f32.mrf.mxu0  ;;  %v2698_v2 = vcombine.high %v2185_v24, %v2189_v11  ;;  %v2700_v20 = vcombine.high %v2186_v15, %v2190_v34 }
 0x201   :  { %v2139_v54 = vadd.f32 %v2138_v61, %v2044_v50  ;;  %v2049_v62 = vadd.f32 %v2048_v58, %v1922_v55  ;;  %v2148_v4 = vmul.f32 %v2137_v9, %v3696_v42  ;;  %v2198_v61 = vld [vmem:[%s3860_s7 + $0xb8] sm:$0xff]  ;;  %v2697_v50 = vcombine.low %v2185_v24, %v2189_v11 }
 0x202   :  { %v2050_v59 = vpop.f32.mrf.mxu0  ;;  %v2708_v49 = vcombine.high %v2194_v45, %v2198_v61  ;;  %v2707_v10 = vcombine.low %v2194_v45, %v2198_v61  ;;  %v2182_v9 = vld [vmem:[%s3860_s7 + $0x38] sm:$0xff]  ;;  %v2699_v55 = vcombine.low %v2186_v15, %v2190_v34 }
 0x203   :  { %v2144_v29 = vadd.f32 %v2143_v5, %v2049_v62  ;;  %v2051_v36 = vadd.f32 %v2050_v59, %v1924_v7  ;;  %2154 = vrot.lane.b32.xlu1 %v2148_v4, %s2879_s1  ;;  %v2149_v6 = vmul.f32 %v2139_v54, %v1426_v19  ;;  %v2692_v47 = vcombine.high %v2178_v46, %v2182_v9 }
 0x204   :  { %v2689_v5 = vcombine.low %v2177_v52, %v2181_v40  ;;  %v2691_v58 = vcombine.low %v2178_v46, %v2182_v9 }
 0x205   :  { %v2146_v18 = vadd.f32 %v2145_v44, %v2051_v36  ;;  %2166 = vrot.lane.b32.xlu0 %v2149_v6, %s2879_s1  ;;  %v2150_v27 = vmul.f32 %v2144_v29, %v1427_v8 }
 0x207   :  { %2156 = vrot.lane.b32.xlu1 %v2150_v27, %s2879_s1  ;;  %v2151_v32 = vmul.f32 %v2146_v18, %v1428_v1  ;;  %v2239_v18 = vsub.s32 7, %v3572_v3 }
 0x20b   :  { %2168 = vrot.lane.b32.xlu1 %v2151_v32, %s2879_s1 }
 0x275   :  { %v2155_v42 = vpop.permute.xlu1 %2154 }
 0x276   :  { %v2160_v13 = vadd.f32 %v2155_v42, %v2148_v4 }
 0x277   :  { %v2167_v48 = vpop.permute.xlu0 %2166 }
 0x278   :  { %v2162_v26 = vadd.f32 %v2160_v13, %v2149_v6 }
 0x279   :  { %v2157_v30 = vpop.permute.xlu1 %2156 }
 0x27a   :  { %v2161_v56 = vadd.f32 %v2157_v30, %v2150_v27  ;;  %v2172_v16 = vadd.f32 %v2167_v48, %v2162_v26 }
 0x27c   :  { %v2163_v23 = vadd.f32 %v2161_v56, %v2151_v32 }
 0x27d   :  { %v2169_v0 = vpop.permute.xlu1 %2168 }
 0x27e   :  { %v2173_v12 = vadd.f32 %v2169_v0, %v2163_v23 }
 0x280   :  { %v2174_v31 = vpack.c.bf16 %v2173_v12, %v2172_v16 }
 0x282   :  { %2717 = vmatmul.mubr.msk.bf16.vlgmr.msra.gmra.mxu0 %vm1445_vm3, %v2174_v31  ;;  %2718 = vmatmul.mubr.msk.bf16.vlgmr.msra.gmra.mxu1 %vm1445_vm3, %v2174_v31 }
 0x283   :  { %2507 = vmatpush1.bf16.msra.mxu0 %v2713_v25  ;;  %2550 = vmatpush1.bf16.msra.mxu1 %v2715_v51 }
 0x284   :  { %2508 = vmatprep.subr.bf16.mxu0 %v2706_v41  ;;  %2551 = vmatprep.subr.bf16.mxu1 %v2708_v49 }
 0x285   :  { %2530 = vmatprep.mubr.bf16.mxu0 %v3889_v63  ;;  %2573 = vmatprep.mubr.bf16.mxu1 %v3889_v63  ;;  %v2207_v63 = vld [vmem:[%s3862_s8] sm:$0xff] }
 0x286   :  { %v2212_v19 = vrot.slane %v2207_v63, %v3583_v38  ;;  %v2220_v25 = vrot.slane %v2207_v63, %v3590_v53  ;;  %v2216_v51 = vrot.slane %v2207_v63, %v3575_v60  ;;  %v2224_v17 = vrot.slane %v2207_v63, %v3607_v22 }
 0x287   :  { %2509 = vmatpush1.bf16.msra.mxu0 %v2705_v57  ;;  %2552 = vmatpush1.bf16.msra.mxu1 %v2707_v10  ;;  %v2228_v27 = vrot.slane %v2207_v63, %v3620_v33  ;;  %v2236_v1 = vrot.slane %v2207_v63, %v3652_v28  ;;  %v2232_v32 = vrot.slane %v2207_v63, %v3643_v39 }
 0x288   :  { %2510 = vmatprep.subr.bf16.mxu0 %v2698_v2  ;;  %2553 = vmatprep.subr.bf16.mxu1 %v2700_v20  ;;  %v2240_v42 = vrot.slane %v2207_v63, %v2239_v18 }
 0x28b   :  { %2511 = vmatpush1.bf16.msra.mxu0 %v2697_v50  ;;  %2554 = vmatpush1.bf16.msra.mxu1 %v2699_v55 }
 0x28c   :  { %2512 = vmatprep.subr.bf16.mxu0 %v2690_v21  ;;  %2555 = vmatprep.subr.bf16.mxu1 %v2692_v47 }
 0x28f   :  { %2513 = vmatpush1.bf16.msra.mxu0 %v2689_v5  ;;  %2556 = vmatpush1.bf16.msra.mxu1 %v2691_v58 }
 0x292   :  { %2719 = vmatmul.mubr.msk.bf16.vlgmr.msra.gmra.mxu0 %vm1445_vm3, %v2174_v31  ;;  %2720 = vmatmul.mubr.msk.bf16.vlgmr.msra.gmra.mxu1 %vm1445_vm3, %v2174_v31 }
 0x342   :  { %v2446_v54 = vpop.f32.mrf.mxu0  ;;  %v2489_v62 = vpop.f32.mrf.mxu1 }
 0x343   :  { %v2447_v7 = vadd.f32 %v2446_v54, %v2212_v19  ;;  %v2490_v4 = vadd.f32 %v2489_v62, %v2220_v25 }
 0x344   :  { %v2448_v59 = vpop.f32.mrf.mxu0  ;;  %v2491_v8 = vpop.f32.mrf.mxu1 }
 0x345   :  { %2584 = vst [vmem:[%s3863_s9] sm:$0xff] %v2447_v7  ;;  %2586 = vst [vmem:[%s3863_s9 + $0x10] sm:$0xff] %v2490_v4  ;;  %v2449_v38 = vadd.f32 %v2448_v59, %v2216_v51  ;;  %v2492_v53 = vadd.f32 %v2491_v8, %v2224_v17 }
 0x346   :  { %v2450_v14 = vpop.f32.mrf.mxu0  ;;  %v2493_v60 = vpop.f32.mrf.mxu1 }
 0x347   :  { %2585 = vst [vmem:[%s3863_s9 + $0x8] sm:$0xff] %v2449_v38  ;;  %2587 = vst [vmem:[%s3863_s9 + $0x18] sm:$0xff] %v2492_v53  ;;  %v2451_v22 = vadd.f32 %v2450_v14, %v2212_v19  ;;  %v2494_v29 = vadd.f32 %v2493_v60, %v2220_v25 }
 0x348   :  { %v2452_v36 = vpop.f32.mrf.mxu0  ;;  %v2495_v6 = vpop.f32.mrf.mxu1 }
 0x349   :  { %2592 = vst [vmem:[%s3863_s9 + $0x40] sm:$0xff] %v2451_v22  ;;  %2594 = vst [vmem:[%s3863_s9 + $0x50] sm:$0xff] %v2494_v29  ;;  %v2453_v37 = vadd.f32 %v2452_v36, %v2216_v51  ;;  %v2496_v44 = vadd.f32 %v2495_v6, %v2224_v17 }
 0x34b   :  { %2593 = vst [vmem:[%s3863_s9 + $0x48] sm:$0xff] %v2453_v37  ;;  %2595 = vst [vmem:[%s3863_s9 + $0x58] sm:$0xff] %v2496_v44 }
 0x352   :  { %v2532_v13 = vpop.f32.mrf.mxu0  ;;  %v2575_v30 = vpop.f32.mrf.mxu1 }
 0x353   :  { %v2533_v26 = vadd.f32 %v2532_v13, %v2228_v27  ;;  %v2576_v56 = vadd.f32 %v2575_v30, %v2236_v1 }
 0x354   :  { %v2534_v23 = vpop.f32.mrf.mxu0  ;;  %v2577_v43 = vpop.f32.mrf.mxu1 }
 0x355   :  { %2588 = vst [vmem:[%s3863_s9 + $0x20] sm:$0xff] %v2533_v26  ;;  %2590 = vst [vmem:[%s3863_s9 + $0x30] sm:$0xff] %v2576_v56  ;;  %v2535_v3 = vadd.f32 %v2534_v23, %v2232_v32  ;;  %v2578_v33 = vadd.f32 %v2577_v43, %v2240_v42 }
 0x356   :  { %v2536_v28 = vpop.f32.mrf.mxu0  ;;  %v2579_v48 = vpop.f32.mrf.mxu1 }
 0x357   :  { %2589 = vst [vmem:[%s3863_s9 + $0x28] sm:$0xff] %v2535_v3  ;;  %2591 = vst [vmem:[%s3863_s9 + $0x38] sm:$0xff] %v2578_v33  ;;  %v2537_v39 = vadd.f32 %v2536_v28, %v2228_v27  ;;  %v2580_v0 = vadd.f32 %v2579_v48, %v2236_v1 }
 0x358   :  { %v2538_v35 = vpop.f32.mrf.mxu0  ;;  %v2581_v45 = vpop.f32.mrf.mxu1 }
 0x359   :  { %2596 = vst [vmem:[%s3863_s9 + $0x60] sm:$0xff] %v2537_v39  ;;  %2598 = vst [vmem:[%s3863_s9 + $0x70] sm:$0xff] %v2580_v0  ;;  %v2539_v61 = vadd.f32 %v2538_v35, %v2232_v32  ;;  %v2582_v16 = vadd.f32 %v2581_v45, %v2240_v42 }
 0x35b   :  { %2597 = vst [vmem:[%s3863_s9 + $0x68] sm:$0xff] %v2539_v61  ;;  %2599 = vst [vmem:[%s3863_s9 + $0x78] sm:$0xff] %v2582_v16 }

</bundles_post_ra>
